<compile_context>
chip_gen: v7x
topology: tpu7x:2x2x1
jax: 0.10.0
libtpu: 0.0.40
codegen_flags: <defaults>
</compile_context>

<pallas_src>
import functools

import jax
import jax.numpy as jnp
from jax import lax
from jax.experimental import pallas as pl
from jax.experimental.pallas import tpu as pltpu

LANE = 128


def _round_up(x, m):
    return ((x + m - 1) // m) * m


# ----------------------------------------------------------------------------
# Kernel A: per-edge relation-typed messages
#   msg[e] = h_src[e] @ W_{type[e]}
# expressed as one lane-dense matmul:  (E_tile, R*H_pad) @ (R*H_pad, H_pad)
# where the left operand is h_src replicated R times along lanes and masked by
# the edge's relation type (mask built in-kernel from the int32 type column).
# ----------------------------------------------------------------------------
def edge_message_kernel(h_src_ref, type_ref, w_ref, msg_ref, *,
                        num_rel_types, h_pad):
    e_tile = h_src_ref.shape[0]
    h_src = h_src_ref[...]                                       # (E_t, H_pad) bf16
    type_col = type_ref[...]                                     # (E_t, 1) int32

    lane = lax.broadcasted_iota(jnp.int32, (e_tile, num_rel_types * h_pad), 1)
    lo = type_col * h_pad                                        # (E_t, 1)
    sel = (lane >= lo) & (lane < lo + h_pad)                     # (E_t, R*H_pad)

    x_rep = jnp.concatenate([h_src] * num_rel_types, axis=1)     # (E_t, R*H_pad)
    x = jnp.where(sel, x_rep, jnp.zeros_like(x_rep))             # masked, bf16

    msg = jnp.dot(x, w_ref[...], preferred_element_type=jnp.float32)
    msg_ref[...] = msg.astype(msg_ref.dtype)                     # bf16 out


# ----------------------------------------------------------------------------
# Kernel B: scatter-add messages to destination nodes + norm + self-loop + ReLU
# Grid (node_tiles "parallel", edge_tiles "arbitrary"); (N_tile, H_pad) f32
# accumulator in scratch; per-tile (N_tile, E_tile) one-hot built in-kernel.
# ----------------------------------------------------------------------------
def scatter_agg_kernel(dst_ref, msg_ref, h_ref, norm_ref, loop_w_ref,
                       out_ref, acc_ref, *, n_tile, apply_relu):
    e = pl.program_id(1)

    @pl.when(e == 0)
    def _():
        acc_ref[...] = jnp.zeros_like(acc_ref)

    e_tile = msg_ref.shape[0]
    node_base = pl.program_id(0) * n_tile
    node_ids = lax.broadcasted_iota(jnp.int32, (n_tile, e_tile), 0) + node_base
    dst = dst_ref[...]                                           # (1, E_t) int32
    onehot = jnp.where(node_ids == dst, 1.0, 0.0).astype(jnp.bfloat16)

    acc_ref[...] += jnp.dot(onehot, msg_ref[...],
                            preferred_element_type=jnp.float32)

    @pl.when(e == pl.num_programs(1) - 1)
    def _():
        loop_msg = jnp.dot(h_ref[...], loop_w_ref[...],
                           preferred_element_type=jnp.float32)
        node = acc_ref[...] * norm_ref[...] + loop_msg
        if apply_relu:
            node = jnp.maximum(node, 0.0)
        out_ref[...] = node.astype(out_ref.dtype)


def rgcn_layer(h_pad_f32, src_pad, dst_row, type_col, norm_pad,
               w_stack_bf16, loop_w_bf16, *, apply_relu, e_tile, n_tile):
    """One RGCNLayer forward (self_loop=True, eval-mode dropout = identity).

    e_tile / n_tile: VMEM tile sizes.  For real graphs use e.g. 512/256 on
    v5e/v6e and roughly half on v7x (64 MiB VMEM)."""
    n_pad, h_pad = h_pad_f32.shape
    e_pad = src_pad.shape[0]
    num_rel_types = w_stack_bf16.shape[0] // h_pad

    h_bf = h_pad_f32.astype(jnp.bfloat16)
    h_src = h_bf[src_pad]                    # O(E*H) XLA gather (index-based)

    msg = pl.pallas_call(
        functools.partial(edge_message_kernel,
                          num_rel_types=num_rel_types, h_pad=h_pad),
        out_shape=jax.ShapeDtypeStruct((e_pad, h_pad), jnp.bfloat16),
        grid=(e_pad // e_tile,),
        in_specs=[
            pl.BlockSpec((e_tile, h_pad), lambda e: (e, 0)),
            pl.BlockSpec((e_tile, 1), lambda e: (e, 0)),
            pl.BlockSpec((num_rel_types * h_pad, h_pad), lambda e: (0, 0)),
        ],
        out_specs=pl.BlockSpec((e_tile, h_pad), lambda e: (e, 0)),
        compiler_params=pltpu.CompilerParams(
            dimension_semantics=("parallel",)),
    )(h_src, type_col, w_stack_bf16)

    out = pl.pallas_call(
        functools.partial(scatter_agg_kernel,
                          n_tile=n_tile, apply_relu=apply_relu),
        out_shape=jax.ShapeDtypeStruct((n_pad, h_pad), jnp.float32),
        grid=(n_pad // n_tile, e_pad // e_tile),
        in_specs=[
            pl.BlockSpec((1, e_tile), lambda n, e: (0, e)),      # dst ids
            pl.BlockSpec((e_tile, h_pad), lambda n, e: (e, 0)),  # messages
            pl.BlockSpec((n_tile, h_pad), lambda n, e: (n, 0)),  # h (self-loop)
            pl.BlockSpec((n_tile, 1), lambda n, e: (n, 0)),      # 1/in-degree
            pl.BlockSpec((h_pad, h_pad), lambda n, e: (0, 0)),   # loop weight
        ],
        out_specs=pl.BlockSpec((n_tile, h_pad), lambda n, e: (n, 0)),
        scratch_shapes=[pltpu.VMEM((n_tile, h_pad), jnp.float32)],
        compiler_params=pltpu.CompilerParams(
            dimension_semantics=("parallel", "arbitrary")),
    )(dst_row, msg, h_bf, norm_pad, loop_w_bf16)

    return out


# ----------------------------------------------------------------------------
# Kernel C: build padded sequence tensor  cat([node_emb, ent_emb, rel_emb]) * mask
# Node rows are gathered in-kernel from the resident h2 block using
# scalar-prefetched (SMEM) indices; output last dim 3*H_pad = 384 is lane-dense.
# ----------------------------------------------------------------------------
def seq_assemble_kernel(gidx_ref, lens_ref, h2_ref, ent_ref, rel_ref, out_ref,
                        *, seq_len, h_pad):
    b = pl.program_id(0)
    rows = []
    for t in range(seq_len):                                     # static unroll
        idx = gidx_ref[b * seq_len + t]                          # SMEM scalar
        rows.append(h2_ref[pl.ds(idx, 1), :])                    # (1, H_pad)
    node = jnp.concatenate(rows, axis=0)                         # (S, H_pad)

    ent = jnp.broadcast_to(ent_ref[pl.ds(b, 1), :], (seq_len, h_pad))
    rel = jnp.broadcast_to(rel_ref[pl.ds(b, 1), :], (seq_len, h_pad))

    t_idx = lax.broadcasted_iota(jnp.int32, (seq_len, 1), 0)
    mask = (t_idx < lens_ref[b]).astype(jnp.float32)             # (S, 1)

    full = jnp.concatenate([node, ent, rel], axis=-1) * mask     # (S, 3*H_pad)
    out_ref[0] = full.astype(out_ref.dtype)


def seq_assemble(gidx_flat, lens, h2_pad, ent_sel_pad, rel_sel_pad, *, seq_len):
    batch = lens.shape[0]
    n_pad, h_pad = h2_pad.shape
    grid_spec = pltpu.PrefetchScalarGridSpec(
        num_scalar_prefetch=2,
        grid=(batch,),
        in_specs=[
            pl.BlockSpec((n_pad, h_pad), lambda i, *_: (0, 0)),   # h2 (resident)
            pl.BlockSpec((batch, h_pad), lambda i, *_: (0, 0)),   # ent rows
            pl.BlockSpec((batch, h_pad), lambda i, *_: (0, 0)),   # rel rows
        ],
        out_specs=pl.BlockSpec((1, seq_len, 3 * h_pad), lambda i, *_: (i, 0, 0)),
    )
    return pl.pallas_call(
        functools.partial(seq_assemble_kernel, seq_len=seq_len, h_pad=h_pad),
        out_shape=jax.ShapeDtypeStruct((batch, seq_len, 3 * h_pad), jnp.float32),
        grid_spec=grid_spec,
        compiler_params=pltpu.CompilerParams(
            dimension_semantics=("arbitrary",)),
    )(gidx_flat, lens, h2_pad, ent_sel_pad, rel_sel_pad)


# ----------------------------------------------------------------------------
# RGCNAggregator.forward  (JAX wrapper around the kernels)
# ----------------------------------------------------------------------------
def rgcn_aggregator_forward(params, graph, node_ids_graph, s_len_non_zero,
                            s_tem, r_tem, ent_embeds, rel_embeds,
                            reverse, seq_len, *, e_tile=128, n_tile=128):
    h_dim = ent_embeds.shape[1]
    num_rel_types = params["rgcn1"]["w_comp"].shape[0]
    num_nodes = graph["node_to_ent"].shape[0]
    num_edges = graph["src"].shape[0]

    h_pad = _round_up(max(h_dim, LANE), LANE)
    n_pad = _round_up(num_nodes, n_tile)
    e_pad = _round_up(num_edges, e_tile)

    # --- node features, zero-padded to (n_pad, h_pad) -------------------------
    h0 = ent_embeds[graph["node_to_ent"]]                        # (N, h_dim)
    h0_pad = jnp.zeros((n_pad, h_pad), jnp.float32).at[:num_nodes, :h_dim].set(h0)

    # --- edge index arrays (O(E) bytes; no dense one-hot) ---------------------
    src = graph["src"].astype(jnp.int32)
    dst = graph["dst"].astype(jnp.int32)
    etype = (graph["type_o"] if reverse else graph["type_s"]).astype(jnp.int32)

    src_pad = jnp.zeros((e_pad,), jnp.int32).at[:num_edges].set(src)
    # padded edges: dst sentinel outside [0, n_pad) -> never scatter;
    #               type sentinel == num_rel_types  -> zero message.
    dst_pad = jnp.full((e_pad,), n_pad, jnp.int32).at[:num_edges].set(dst)
    type_pad = jnp.full((e_pad,), num_rel_types, jnp.int32).at[:num_edges].set(etype)
    dst_row = dst_pad.reshape(1, e_pad)
    type_col = type_pad.reshape(e_pad, 1)

    # --- degree norm from indices (O(E)) ---------------------------------------
    deg = jnp.zeros((n_pad,), jnp.float32).at[dst].add(1.0)
    norm_pad = (1.0 / jnp.maximum(deg, 1.0)).reshape(n_pad, 1)

    # --- compose basis-decomposed weights, pad, stack, cast to bf16 ------------
    def make_weights(p):
        wrel = jnp.einsum("rb,bij->rij", p["w_comp"], p["basis"])   # (R, h, h)
        wrel_pad = jnp.zeros((num_rel_types, h_pad, h_pad), jnp.float32)
        wrel_pad = wrel_pad.at[:, :h_dim, :h_dim].set(wrel)
        w_stack = wrel_pad.reshape(num_rel_types * h_pad, h_pad).astype(jnp.bfloat16)
        loop_w = jnp.zeros((h_pad, h_pad), jnp.float32).at[:h_dim, :h_dim].set(p["loop_w"])
        return w_stack, loop_w.astype(jnp.bfloat16)

    w1, lw1 = make_weights(params["rgcn1"])
    w2, lw2 = make_weights(params["rgcn2"])

    # --- two RGCN layers --------------------------------------------------------
    h1 = rgcn_layer(h0_pad, src_pad, dst_row, type_col, norm_pad, w1, lw1,
                    apply_relu=True, e_tile=e_tile, n_tile=n_tile)
    h2 = rgcn_layer(h1, src_pad, dst_row, type_col, norm_pad, w2, lw2,
                    apply_relu=False, e_tile=e_tile, n_tile=n_tile)

    # --- sequence assembly (in-kernel row gather, lane-dense output) -----------
    lens = s_len_non_zero.astype(jnp.int32)
    total = node_ids_graph.shape[0]
    offsets = jnp.concatenate([jnp.zeros((1,), jnp.int32), jnp.cumsum(lens)[:-1]])
    t_idx = jnp.arange(seq_len, dtype=jnp.int32)[None, :]
    flat = jnp.clip(offsets[:, None] + t_idx, 0, total - 1)       # (B, S)
    gidx = node_ids_graph.astype(jnp.int32)[flat]                 # rows of h2
    gidx_flat = gidx.reshape(-1)

    batch = lens.shape[0]
    ent_sel = jnp.zeros((batch, h_pad), jnp.float32).at[:, :h_dim].set(ent_embeds[s_tem])
    rel_sel = jnp.zeros((batch, h_pad), jnp.float32).at[:, :h_dim].set(rel_embeds[r_tem])

    out_pad = seq_assemble(gidx_flat, lens, h2, ent_sel, rel_sel, seq_len=seq_len)

    # slice padded lanes back to the real [node | ent | rel] = 3*h_dim layout
    s_embed_seq_tensor = jnp.concatenate(
        [out_pad[..., 0:h_dim],
         out_pad[..., h_pad:h_pad + h_dim],
         out_pad[..., 2 * h_pad:2 * h_pad + h_dim]], axis=-1)
    # dropout: eval mode -> identity
    # pack_padded_sequence -> return (padded tensor, lengths)
    return s_embed_seq_tensor, lens


# ----------------------------------------------------------------------------
# Pure-JAX f32 reference (for a correctness sanity check)
# ----------------------------------------------------------------------------
def _reference(params, graph, node_ids_graph, s_len_non_zero, s_tem, r_tem,
               ent_embeds, rel_embeds, reverse, seq_len):
    num_rel_types = params["rgcn1"]["w_comp"].shape[0]
    num_nodes = graph["node_to_ent"].shape[0]
    h = ent_embeds[graph["node_to_ent"]]
    src_oh = jax.nn.one_hot(graph["src"], num_nodes, dtype=jnp.float32)
    dst_oh = jax.nn.one_hot(graph["dst"], num_nodes, dtype=jnp.float32).T
    edge_type = graph["type_o"] if reverse else graph["type_s"]
    type_oh = jax.nn.one_hot(edge_type, num_rel_types, dtype=jnp.float32)
    norm = 1.0 / jnp.maximum(jnp.sum(dst_oh, axis=1, keepdims=True), 1.0)

    def layer(h, p, relu):
        wrel = jnp.einsum("rb,bij->rij", p["w_comp"], p["basis"])
        h_src = src_oh @ h
        w_e = jnp.einsum("er,rij->eij", type_oh, wrel)
        msg = jnp.einsum("ei,eij->ej", h_src, w_e)
        node = (dst_oh @ msg) * norm + h @ p["loop_w"]
        return jnp.maximum(node, 0.0) if relu else node

    h = layer(h, params["rgcn1"], True)
    h = layer(h, params["rgcn2"], False)
    embeds_sel = h[node_ids_graph]
    lens = s_len_non_zero.astype(jnp.int32)
    offsets = jnp.concatenate([jnp.zeros((1,), jnp.int32), jnp.cumsum(lens)[:-1]])
    t_idx = jnp.arange(seq_len, dtype=jnp.int32)[None, :]
    mask = (t_idx < lens[:, None]).astype(jnp.float32)[:, :, None]
    flat_idx = jnp.clip(offsets[:, None] + t_idx, 0, embeds_sel.shape[0] - 1)
    node_pad = embeds_sel[flat_idx]
    b, s, hd = node_pad.shape
    ent_b = jnp.broadcast_to(ent_embeds[s_tem][:, None, :], (b, s, hd))
    rel_b = jnp.broadcast_to(rel_embeds[r_tem][:, None, :], (b, s, hd))
    return jnp.concatenate([node_pad, ent_b, rel_b], axis=-1) * mask


# ----------------------------------------------------------------------------
if __name__ == "__main__":
    key = jax.random.PRNGKey(0)
    ks = jax.random.split(key, 16)

    # Small shapes consistent with the module's __init__ / forward.
    h_dim = 32
    num_rels = 4
    num_rel_types = 2 * num_rels          # RGCNAggregator uses 2*num_rels
    num_bases = 2
    num_entities = 20                     # entity table size
    seq_len = 8
    num_graph_nodes = 24                  # nodes of the batched history graph
    num_edges = 48

    s_len_non_zero = jnp.array([4, 3, 2], dtype=jnp.int32)   # sorted descending
    batch = int(s_len_non_zero.shape[0])
    total = int(jnp.sum(s_len_non_zero))

    def p_init(k):
        k1, k2, k3 = jax.random.split(k, 3)
        scale = 1.0 / jnp.sqrt(h_dim)
        return {
            "basis": jax.random.normal(k1, (num_bases, h_dim, h_dim), jnp.float32) * scale,
            "w_comp": jax.random.normal(k2, (num_rel_types, num_bases), jnp.float32) * scale,
            "loop_w": jax.random.normal(k3, (h_dim, h_dim), jnp.float32) * scale,
        }

    params = {"rgcn1": p_init(ks[0]), "rgcn2": p_init(ks[1])}

    ent_embeds = jax.random.normal(ks[2], (num_entities, h_dim), jnp.float32)
    rel_embeds = jax.random.normal(ks[3], (num_rels, h_dim), jnp.float32)

    # Synthetic batched history graph (stands in for get_sorted_s_r_embed_rgcn).
    graph = {
        "node_to_ent": jax.random.randint(ks[4], (num_graph_nodes,), 0, num_entities),
        "src": jax.random.randint(ks[5], (num_edges,), 0, num_graph_nodes),
        "dst": jax.random.randint(ks[6], (num_edges,), 0, num_graph_nodes),
        "type_s": jax.random.randint(ks[7], (num_edges,), 0, num_rel_types),
        "type_o": jax.random.randint(ks[8], (num_edges,), 0, num_rel_types),
    }
    node_ids_graph = jax.random.randint(ks[9], (total,), 0, num_graph_nodes)
    s_tem = jax.random.randint(ks[10], (batch,), 0, num_entities)
    r_tem = jax.random.randint(ks[11], (batch,), 0, num_rels)

    out, lens = rgcn_aggregator_forward(
        params, graph, node_ids_graph, s_len_non_zero, s_tem, r_tem,
        ent_embeds, rel_embeds, reverse=False, seq_len=seq_len)
    jax.block_until_ready(out)

    ref = _reference(params, graph, node_ids_graph, s_len_non_zero, s_tem, r_tem,
                     ent_embeds, rel_embeds, False, seq_len)
    assert out.shape == (batch, seq_len, 3 * h_dim), out.shape
    # bf16 MXU inputs (f32 accumulation) -> compare against the f32 reference
    # with a correspondingly looser tolerance.
    assert jnp.allclose(out, ref, rtol=5e-2, atol=5e-2), "mismatch vs reference"

    print("KERNEL_OK")
</pallas_src>

<mosaic_0001>
module attributes {stable_mosaic.version = 11 : i64} {
  func.func @edge_message_kernel(%arg0: i32, %arg1: memref<128x128xbf16, #tpu.memory_space<vmem>>, %arg2: memref<128x1xi32, #tpu.memory_space<vmem>>, %arg3: memref<1024x128xbf16, #tpu.memory_space<vmem>>, %arg4: memref<128x128xbf16, #tpu.memory_space<vmem>>) attributes {dimension_semantics = [#tpu.dimension_semantics<parallel>], iteration_bounds = array<i64: 1>, scalar_prefetch = 0 : i64, scratch_operands = 0 : i64, tpu.core_type = #tpu.core_type<tc>, window_params = [{transform_indices = @transform_0, window_bounds = array<i64: 128, 128>}, {transform_indices = @transform_1, window_bounds = array<i64: 128, 1>}, {pipeline_mode = #tpu.pipeline_mode<synchronous>, transform_indices = @transform_2, window_bounds = array<i64: 1024, 128>}, {transform_indices = @transform_3, window_bounds = array<i64: 128, 128>}]} {
    %c0 = arith.constant 0 : index
    %c0_0 = arith.constant 0 : index
    %0 = vector.load %arg1[%c0, %c0_0] : memref<128x128xbf16, #tpu.memory_space<vmem>>, vector<128x128xbf16>
    %c0_1 = arith.constant 0 : index
    %c0_2 = arith.constant 0 : index
    %1 = vector.load %arg2[%c0_1, %c0_2] : memref<128x1xi32, #tpu.memory_space<vmem>>, vector<128x1xi32>
    %2 = tpu.iota {dimensions = array<i32: 1>} : vector<128x1024xi32>
    %c128_i32 = arith.constant 128 : i32
    %3 = vector.broadcast %c128_i32 : i32 to vector<128x1xi32>
    %4 = arith.muli %1, %3 : vector<128x1xi32>
    %5 = vector.broadcast %4 : vector<128x1xi32> to vector<128x1024xi32>
    %6 = arith.cmpi sge, %2, %5 : vector<128x1024xi32>
    %c128_i32_3 = arith.constant 128 : i32
    %7 = vector.broadcast %c128_i32_3 : i32 to vector<128x1xi32>
    %8 = arith.addi %4, %7 : vector<128x1xi32>
    %9 = vector.broadcast %8 : vector<128x1xi32> to vector<128x1024xi32>
    %10 = arith.cmpi slt, %2, %9 : vector<128x1024xi32>
    %11 = arith.andi %6, %10 : vector<128x1024xi1>
    %12 = tpu.concatenate %0, %0, %0, %0, %0, %0, %0, %0 in 1 : vector<128x128xbf16>, vector<128x128xbf16>, vector<128x128xbf16>, vector<128x128xbf16>, vector<128x128xbf16>, vector<128x128xbf16>, vector<128x128xbf16>, vector<128x128xbf16> -> vector<128x1024xbf16>
    %cst = arith.constant 0.000000e+00 : bf16
    %13 = vector.broadcast %cst : bf16 to vector<128x1024xbf16>
    %14 = arith.select %11, %12, %13 : vector<128x1024xi1>, vector<128x1024xbf16>
    %c0_4 = arith.constant 0 : index
    %c0_5 = arith.constant 0 : index
    %15 = vector.load %arg3[%c0_4, %c0_5] : memref<1024x128xbf16, #tpu.memory_space<vmem>>, vector<1024x128xbf16>
    %cst_6 = arith.constant dense<0.000000e+00> : vector<128x128xf32>
    %16 = tpu.matmul %14, %15, %cst_6 {dimension_numbers = #tpu.dot_dimension_numbers<[1], [0], [0], [1], [0, 0, 1, 1], [], []>} : vector<128x1024xbf16>, vector<1024x128xbf16>, vector<128x128xf32> -> vector<128x128xf32>
    %17 = arith.truncf %16 : vector<128x128xf32> to vector<128x128xbf16>
    %c0_7 = arith.constant 0 : index
    %c0_8 = arith.constant 0 : index
    %18 = vector.load %arg4[%c0_7, %c0_8] : memref<128x128xbf16, #tpu.memory_space<vmem>>, vector<128x128xbf16>
    tpu.vector_store %arg4[%c0_7, %c0_8], %17 {strides = array<i32>} : memref<128x128xbf16, #tpu.memory_space<vmem>>, vector<128x128xbf16>,
    return
  }
  func.func @transform_0(%arg0: i32) -> (i32, i32) {
    %c0_i32 = arith.constant 0 : i32
    %c0_i32_0 = arith.constant 0 : i32
    return %arg0, %c0_i32 : i32, i32
  }
  func.func @transform_1(%arg0: i32) -> (i32, i32) {
    %c0_i32 = arith.constant 0 : i32
    %c0_i32_0 = arith.constant 0 : i32
    return %arg0, %c0_i32 : i32, i32
  }
  func.func @transform_2(%arg0: i32) -> (i32, i32) {
    %c0_i32 = arith.constant 0 : i32
    %c0_i32_0 = arith.constant 0 : i32
    %c0_i32_1 = arith.constant 0 : i32
    return %c0_i32, %c0_i32_0 : i32, i32
  }
  func.func @transform_3(%arg0: i32) -> (i32, i32) {
    %c0_i32 = arith.constant 0 : i32
    %c0_i32_0 = arith.constant 0 : i32
    return %arg0, %c0_i32 : i32, i32
  }
}

</mosaic_0001>

<bundles_post_ra>
// kernel: tpu_custom_call.1
= control target key start
LH: loop header
LB: loop body
LE: loop exit
PB: predicated region body
PF: predicated region fallthrough
CT: control target
= control target key end

     0   :  { %8 = vsyncpa [#allocation3], 0  ;;  %s3204_s0 = inlined_call_operand.vmem [shape: bf16[128,128], index: 0, kind: input, shape index: {}]   ;;  %s3205_s1 = inlined_call_operand.vmem [shape: s32[128,1], index: 1, kind: input, shape index: {}]   ;;  %s3206_s2 = inlined_call_operand.hbm [shape: bf16[1024,128], index: 2, kind: input, shape index: {}]   ;;  %s3207_s3 = inlined_call_operand.hbm [shape: bf16[128,128], index: 3, kind: output, shape index: {}]  }
   0x1   :  { %9 = vsyncpa [#allocation4], 0  ;;  %s2290_s12 = smov [#allocation2]   ;;  %s2242_s16 = scalar_lea.hbm %s3206_s2, 8192 }
   0x2   :  { %s19_s13 = sshll.u32 %s2290_s12, 4  ;;  %p2243_p0 = scmp.ne.s32.totalorder %s3206_s2, %s2242_s16  ;;  %s20_s13 = int_to_ptr.vmem [resolvable:$true] %s19_s13 }
   0x3   :  { %p2246_p1 = scmp.lt.u32.totalorder %s2242_s16, %s3206_s2 }
   0x5   :  { %p2248_p2 = pnand %p2246_p1, %p2243_p0 }
   0x7   :  { %2251 = shalt.err (!%p2248_p2)
}
   0x8   :  { %s2252_s21 = scalar_lea.vmem %s20_s13, 8192  ;;  %p2257_p4 = scmp.lt.s32.totalorder %s20_s13, %s20_s13 }
   0x9   :  { %p2253_p3 = scmp.ne.s32.totalorder %s20_s13, %s2252_s21  ;;  %p2258_p5 = scmp.lt.s32.totalorder %s2252_s21, %s2252_s21 }
   0xb   :  { %p2259_p6 = por %p2258_p5, %p2257_p4 }
   0xd   :  { %p2260_p7 = pnand %p2259_p6, %p2253_p3 }
   0xf   :  { %2263 = shalt.err (!%p2260_p7)
}
  0x10   :  { %s2291_s22 = smov 64   ;;  %s2292_s23 = smov 4  }
  0x11   :  { %25 = dma.hbm_to_vmem [thread:$0]  %s3206_s2, 8192, %s20_s13, [#allocation3], %s2291_s22, %s2291_s22, %s2292_s23  }
  0x12   :  { %2286 = dma.done.wait [#allocation3], 8192  }
  0x13   :  { %2287 = vsyncadd [#allocation3], 4294959104  ;;  %v2293_v0 = vmov 0   ;;  %v46_v1 = vld [vmem:[%s3205_s1] sm:$0xff]  ;;  %v47_v2 = vld [vmem:[%s3205_s1 + $0x8] sm:$0xff] }
  0x14   :  { %2168 = vset.pattern.permute.xlu0 %v2293_v0  ;;  %2169 = vset.pattern.permute.xlu1 %v2293_v0  ;;  %v71_v3 = vmul.u32 128, %v46_v1  ;;  %v72_v4 = vmul.u32 128, %v47_v2  ;;  %v48_v6 = vld [vmem:[%s3205_s1 + $0x10] sm:$0xff]  ;;  %v49_v8 = vld [vmem:[%s3205_s1 + $0x18] sm:$0xff]  ;;  %v2170_v9 = vld [vmem:[#allocation2 + $0x40] sm:$0xff]  }
  0x15   :  { %v73_v10 = vmul.u32 128, %v48_v6  ;;  %1907 = vmatprep.subr.bf16.mxu0 %v2170_v9  ;;  %v74_v11 = vmul.u32 128, %v49_v8  ;;  %v50_v13 = vld [vmem:[%s3205_s1 + $0x20] sm:$0xff]  ;;  %v51_v16 = vld [vmem:[%s3205_s1 + $0x28] sm:$0xff]  ;;  %v2178_v25 = vld [vmem:[#allocation2 + $0x50] sm:$0xff]  }
  0x16   :  { %88 = vperm.xlu0 %2168, %v71_v3   ;;  %v263_v5 = vadd.s32 128, %v71_v3  ;;  %v264_v7 = vadd.s32 128, %v72_v4  ;;  %v2171_v14 = vld [vmem:[#allocation2] sm:$0xff]   ;;  %v2174_v19 = vld [vmem:[#allocation2 + $0x48] sm:$0xff]   ;;  %v75_v21 = vmul.u32 128, %v50_v13  ;;  %v76_v24 = vmul.u32 128, %v51_v16 }
  0x17   :  { %v265_v12 = vadd.s32 128, %v73_v10  ;;  %v2172_v15 = vld [vmem:[#allocation2 + $0xc0] sm:$0xff]   ;;  %1908 = vmatpush3.bf16.msra.mxu0 %v2171_v14  ;;  %v266_v18 = vadd.s32 128, %v74_v11  ;;  %v2175_v20 = vld [vmem:[#allocation2 + $0x8] sm:$0xff]   ;;  %v52_v26 = vld [vmem:[%s3205_s1 + $0x30] sm:$0xff] }
  0x18   :  { %280 = vperm.xlu1 %2169, %v263_v5   ;;  %1971 = vmatprep.subr.bf16.mxu1 %v2172_v15  ;;  %v2173_v17 = vld [vmem:[#allocation2 + $0x80] sm:$0xff]   ;;  %v2176_v22 = vld [vmem:[#allocation2 + $0xc8] sm:$0xff]   ;;  %v2179_v27 = vld [vmem:[#allocation2 + $0x10] sm:$0xff]   ;;  %v267_v28 = vadd.s32 128, %v75_v21  ;;  %v268_v32 = vadd.s32 128, %v76_v24  ;;  %v77_v35 = vmul.u32 128, %v52_v26 }
  0x19   :  { %1972 = vmatpush3.bf16.msra.mxu1 %v2173_v17  ;;  %1909 = vmatprep.subr.bf16.mxu0 %v2174_v19  ;;  %v2177_v23 = vld [vmem:[#allocation2 + $0x88] sm:$0xff]   ;;  %v2180_v29 = vld [vmem:[#allocation2 + $0xd0] sm:$0xff]   ;;  %v53_v30 = vld [vmem:[%s3205_s1 + $0x38] sm:$0xff]  ;;  %v62_v19 = vlaneseq }
  0x1a   :  { %91 = vperm.xlu0 %2168, %v72_v4   ;;  %1973 = vmatprep.subr.bf16.mxu1 %v2176_v22  ;;  %v2181_v31 = vld [vmem:[#allocation2 + $0x90] sm:$0xff]   ;;  %v2182_v33 = vld [vmem:[#allocation2 + $0x58] sm:$0xff]   ;;  %v78_v38 = vmul.u32 128, %v53_v30  ;;  %v2186_v39 = vld [vmem:[#allocation2 + $0x60] sm:$0xff]   ;;  %v269_v42 = vadd.s32 128, %v77_v35 }
  0x1b   :  { %1910 = vmatpush3.bf16.msra.mxu0 %v2175_v20  ;;  %v2183_v34 = vld [vmem:[#allocation2 + $0x18] sm:$0xff]   ;;  %v54_v40 = vld [vmem:[%s3205_s1 + $0x40] sm:$0xff]  ;;  %v55_v44 = vld [vmem:[%s3205_s1 + $0x48] sm:$0xff]  ;;  %v2378_v20 = vand.u32 127, %v62_v19 }
  0x1c   :  { %283 = vperm.xlu1 %2169, %v264_v7   ;;  %1911 = vmatprep.subr.bf16.mxu0 %v2178_v25  ;;  %v2184_v36 = vld [vmem:[#allocation2 + $0xd8] sm:$0xff]   ;;  %v2187_v41 = vld [vmem:[#allocation2 + $0x20] sm:$0xff]   ;;  %v270_v46 = vadd.s32 128, %v78_v38  ;;  %v2190_v47 = vld [vmem:[#allocation2 + $0x68] sm:$0xff]   ;;  %v79_v49 = vmul.u32 128, %v54_v40  ;;  %v80_v52 = vmul.u32 128, %v55_v44 }
  0x1d   :  { %1974 = vmatpush3.bf16.msra.mxu1 %v2177_v23  ;;  %v2185_v37 = vld [vmem:[#allocation2 + $0x98] sm:$0xff]   ;;  %v2188_v43 = vld [vmem:[#allocation2 + $0xe0] sm:$0xff]   ;;  %v2191_v48 = vld [vmem:[#allocation2 + $0x28] sm:$0xff]   ;;  %v2384_v22 = vadd.s32 384, %v2378_v20 }
  0x1e   :  { %94 = vperm.xlu0 %2168, %v73_v10   ;;  %1975 = vmatprep.subr.bf16.mxu1 %v2180_v29  ;;  %v2189_v45 = vld [vmem:[#allocation2 + $0xa0] sm:$0xff]   ;;  %v2192_v50 = vld [vmem:[#allocation2 + $0xe8] sm:$0xff]   ;;  %v2194_v53 = vld [vmem:[#allocation2 + $0x70] sm:$0xff]   ;;  %v271_v56 = vadd.s32 128, %v79_v49  ;;  %v272_v60 = vadd.s32 128, %v80_v52 }
  0x1f   :  { %1912 = vmatpush3.bf16.msra.mxu0 %v2179_v27  ;;  %v2193_v51 = vld [vmem:[#allocation2 + $0xa8] sm:$0xff]   ;;  %v56_v54 = vld [vmem:[%s3205_s1 + $0x50] sm:$0xff]  ;;  %v57_v58 = vld [vmem:[%s3205_s1 + $0x58] sm:$0xff] }
  0x20   :  { %97 = vperm.xlu1 %2169, %v74_v11   ;;  %1913 = vmatprep.subr.bf16.mxu0 %v2182_v33  ;;  %v2195_v55 = vld [vmem:[#allocation2 + $0x30] sm:$0xff]   ;;  %v2198_v61 = vld [vmem:[#allocation2 + $0x78] sm:$0xff]   ;;  %v81_v63 = vmul.u32 128, %v56_v54  ;;  %v82_v2 = vmul.u32 128, %v57_v58  ;;  %v2203_v3 = vld [vmem:[#allocation2 + $0x140] sm:$0xff]  }
  0x21   :  { %1976 = vmatpush3.bf16.msra.mxu1 %v2181_v31  ;;  %v2196_v57 = vld [vmem:[#allocation2 + $0xf0] sm:$0xff]   ;;  %v2199_v62 = vld [vmem:[#allocation2 + $0x38] sm:$0xff]   ;;  %v58_v5 = vld [vmem:[%s3205_s1 + $0x60] sm:$0xff] }
  0x22   :  { %286 = vperm.xlu0 %2168, %v265_v12   ;;  %1977 = vmatprep.subr.bf16.mxu1 %v2184_v36  ;;  %v2197_v59 = vld [vmem:[#allocation2 + $0xb0] sm:$0xff]   ;;  %v2200_v0 = vld [vmem:[#allocation2 + $0xf8] sm:$0xff]   ;;  %v273_v4 = vadd.s32 128, %v81_v63  ;;  %v2205_v6 = vld [vmem:[#allocation2 + $0x1c0] sm:$0xff]   ;;  %v274_v7 = vadd.s32 128, %v82_v2  ;;  %v83_v9 = vmul.u32 128, %v58_v5 }
  0x23   :  { %1914 = vmatpush3.bf16.msra.mxu0 %v2183_v34  ;;  %v2201_v1 = vld [vmem:[#allocation2 + $0xb8] sm:$0xff]   ;;  %v59_v8 = vld [vmem:[%s3205_s1 + $0x68] sm:$0xff]  ;;  %v60_v12 = vld [vmem:[%s3205_s1 + $0x70] sm:$0xff] }
  0x24   :  { %289 = vperm.xlu1 %2169, %v266_v18   ;;  %1915 = vmatprep.subr.bf16.mxu0 %v2186_v39  ;;  %v84_v10 = vmul.u32 128, %v59_v8  ;;  %v275_v11 = vadd.s32 128, %v83_v9  ;;  %v61_v14 = vld [vmem:[%s3205_s1 + $0x78] sm:$0xff]  ;;  %v85_v15 = vmul.u32 128, %v60_v12  ;;  %v2424_v30 = vld [vmem:[%s3204_s0] sm:$0xff]   ;;  %v2208_v39 = vld [vmem:[#allocation2 + $0x148] sm:$0xff]  }
  0x25   :  { %1978 = vmatpush3.bf16.msra.mxu1 %v2185_v37  ;;  %v86_v16 = vmul.u32 128, %v61_v14  ;;  %v2210_v44 = vld [vmem:[#allocation2 + $0x1c8] sm:$0xff]   ;;  %v2218_v54 = vld [vmem:[#allocation2 + $0x158] sm:$0xff]   ;;  %v2236_v19 = vld [vmem:[#allocation2 + $0x1b0] sm:$0xff]  }
  0x26   :  { %100 = vperm.xlu0 %2168, %v75_v21   ;;  %1979 = vmatprep.subr.bf16.mxu1 %v2188_v43  ;;  %v276_v13 = vadd.s32 128, %v84_v10  ;;  %v277_v17 = vadd.s32 128, %v85_v15  ;;  %v2381_v21 = vadd.s32 128, %v2378_v20  ;;  %v2478_v43 = vld [vmem:[%s3204_s0 + $0x8] sm:$0xff]   ;;  %v2238_v27 = vld [vmem:[#allocation2 + $0x178] sm:$0xff]  }
  0x27   :  { %1916 = vmatpush3.bf16.msra.mxu0 %v2187_v41  ;;  %v278_v18 = vadd.s32 128, %v86_v16  ;;  %v2231_v14 = vld [vmem:[#allocation2 + $0x1a8] sm:$0xff]   ;;  %v2240_v31 = vld [vmem:[#allocation2 + $0x1f8] sm:$0xff]  }
  0x28   :  { %103 = vperm.xlu1 %2169, %v76_v24   ;;  %1917 = vmatprep.subr.bf16.mxu0 %v2190_v47  ;;  %v2389_v24 = vadd.s32 256, %v2378_v20  ;;  %v2209_v47 = vld [vmem:[#allocation2 + $0x108] sm:$0xff]  }
  0x29   :  { %1980 = vmatpush3.bf16.msra.mxu1 %v2189_v45 }
  0x2a   :  { %292 = vperm.xlu0 %2168, %v267_v28   ;;  %1981 = vmatprep.subr.bf16.mxu1 %v2192_v50  ;;  %v2211_v50 = vld [vmem:[#allocation2 + $0x188] sm:$0xff]   ;;  %v2606_v28 = vld [vmem:[%s3204_s0 + $0x18] sm:$0xff]  }
  0x2b   :  { %1918 = vmatpush3.bf16.msra.mxu0 %v2191_v48  ;;  %v2213_v48 = vld [vmem:[#allocation2 + $0x150] sm:$0xff]  }
  0x2c   :  { %295 = vperm.xlu1 %2169, %v268_v32   ;;  %1919 = vmatprep.subr.bf16.mxu0 %v2194_v53  ;;  %v2215_v53 = vld [vmem:[#allocation2 + $0x1d0] sm:$0xff]  }
  0x2d   :  { %1982 = vmatpush3.bf16.msra.mxu1 %v2193_v51 }
  0x2e   :  { %106 = vperm.xlu0 %2168, %v77_v35   ;;  %1983 = vmatprep.subr.bf16.mxu1 %v2196_v57  ;;  %v2216_v57 = vld [vmem:[#allocation2 + $0x190] sm:$0xff]  }
  0x2f   :  { %1920 = vmatpush3.bf16.msra.mxu0 %v2195_v55 }
  0x30   :  { %109 = vperm.xlu1 %2169, %v78_v38   ;;  %1921 = vmatprep.subr.bf16.mxu0 %v2198_v61  ;;  %v2204_v38 = vld [vmem:[#allocation2 + $0x100] sm:$0xff]  }
  0x31   :  { %1984 = vmatpush3.bf16.msra.mxu1 %v2197_v59  ;;  %v2220_v59 = vld [vmem:[#allocation2 + $0x1d8] sm:$0xff]  }
  0x32   :  { %298 = vperm.xlu0 %2168, %v269_v42   ;;  %1985 = vmatprep.subr.bf16.mxu1 %v2200_v0  ;;  %v2206_v42 = vld [vmem:[#allocation2 + $0x180] sm:$0xff]   ;;  %v2539_v0 = vld [vmem:[%s3204_s0 + $0x10] sm:$0xff]  }
  0x33   :  { %1922 = vmatpush3.bf16.msra.mxu0 %v2199_v62  ;;  %v2221_v62 = vld [vmem:[#allocation2 + $0x198] sm:$0xff]  }
  0x34   :  { %301 = vperm.xlu1 %2169, %v270_v46   ;;  %2035 = vmatprep.subr.bf16.mxu0 %v2203_v3 }
  0x35   :  { %1986 = vmatpush3.bf16.msra.mxu1 %v2201_v1  ;;  %v2225_v1 = vld [vmem:[#allocation2 + $0x1e0] sm:$0xff]  }
  0x36   :  { %112 = vperm.xlu0 %2168, %v79_v49   ;;  %2099 = vmatprep.subr.bf16.mxu1 %v2205_v6  ;;  %v2228_v6 = vld [vmem:[#allocation2 + $0x168] sm:$0xff]  }
  0x38   :  { %115 = vperm.xlu1 %2169, %v80_v52   ;;  %v2214_v52 = vld [vmem:[#allocation2 + $0x110] sm:$0xff]  }
  0x3a   :  { %304 = vperm.xlu0 %2168, %v271_v56  }
  0x3c   :  { %307 = vperm.xlu1 %2169, %v272_v60   ;;  %v2219_v60 = vld [vmem:[#allocation2 + $0x118] sm:$0xff]  }
  0x3e   :  { %118 = vperm.xlu0 %2168, %v81_v63   ;;  %v2223_v63 = vld [vmem:[#allocation2 + $0x160] sm:$0xff]  }
  0x40   :  { %121 = vperm.xlu1 %2169, %v82_v2  }
  0x42   :  { %310 = vperm.xlu0 %2168, %v273_v4   ;;  %v2224_v4 = vld [vmem:[#allocation2 + $0x120] sm:$0xff]  }
  0x44   :  { %313 = vperm.xlu1 %2169, %v274_v7   ;;  %v2226_v7 = vld [vmem:[#allocation2 + $0x1a0] sm:$0xff]  }
  0x46   :  { %124 = vperm.xlu0 %2168, %v83_v9   ;;  %v2229_v9 = vld [vmem:[#allocation2 + $0x128] sm:$0xff]  }
  0x48   :  { %127 = vperm.xlu1 %2169, %v84_v10   ;;  %v2230_v10 = vld [vmem:[#allocation2 + $0x1e8] sm:$0xff]  }
  0x4a   :  { %316 = vperm.xlu0 %2168, %v275_v11   ;;  %v2233_v11 = vld [vmem:[#allocation2 + $0x170] sm:$0xff]  }
  0x4c   :  { %319 = vperm.xlu1 %2169, %v276_v13  }
  0x4e   :  { %130 = vperm.xlu0 %2168, %v85_v15  }
  0x50   :  { %133 = vperm.xlu1 %2169, %v86_v16   ;;  %v2235_v16 = vld [vmem:[#allocation2 + $0x1f0] sm:$0xff]  }
  0x52   :  { %322 = vperm.xlu0 %2168, %v277_v17   ;;  %v2234_v17 = vld [vmem:[#allocation2 + $0x130] sm:$0xff]  }
  0x54   :  { %325 = vperm.xlu1 %2169, %v278_v18  }
  0x95   :  { %v2386_v23 = vpop.permute.xlu0 %88 }
  0x96   :  { %vm136_vm0 = vcmp.ge.s32.totalorder %v2381_v21, %v2386_v23  ;;  %vm138_vm1 = vcmp.ge.s32.totalorder %v2384_v22, %v2386_v23  ;;  %vm135_vm4 = vcmp.ge.s32.totalorder %v2378_v20, %v2386_v23  ;;  %vm137_vm7 = vcmp.ge.s32.totalorder %v2389_v24, %v2386_v23 }
  0x97   :  { %v2393_v25 = vpop.permute.xlu1 %280 }
  0x98   :  { %vm328_vm2 = vcmp.lt.s32.totalorder %v2381_v21, %v2393_v25  ;;  %vm330_vm3 = vcmp.lt.s32.totalorder %v2384_v22, %v2393_v25  ;;  %vm327_vm5 = vcmp.lt.s32.totalorder %v2378_v20, %v2393_v25  ;;  %vm329_vm8 = vcmp.lt.s32.totalorder %v2389_v24, %v2393_v25 }
  0x99   :  { %v2405_v26 = vpop.permute.xlu0 %91  ;;  %vm2407_vm6 = vmand %vm136_vm0, %vm328_vm2 }
  0x9a   :  { %vm2415_vm9 = vmand %vm138_vm1, %vm330_vm3  ;;  %vm144_vm11 = vcmp.ge.s32.totalorder %v2381_v21, %v2405_v26  ;;  %vm146_vm1 = vcmp.ge.s32.totalorder %v2384_v22, %v2405_v26 }
  0x9b   :  { %v2419_v29 = vpop.permute.xlu1 %283  ;;  %vm2426_vm10 = vmand %vm135_vm4, %vm327_vm5  ;;  %vm143_vm5 = vcmp.ge.s32.totalorder %v2378_v20, %v2405_v26 }
  0x9c   :  { %vm336_vm12 = vcmp.lt.s32.totalorder %v2381_v21, %v2419_v29  ;;  %vm338_vm13 = vcmp.lt.s32.totalorder %v2384_v22, %v2419_v29  ;;  %vm2436_vm14 = vmand %vm137_vm7, %vm329_vm8  ;;  %vm335_vm2 = vcmp.lt.s32.totalorder %v2378_v20, %v2419_v29 }
  0x9d   :  { %v2440_v33 = vpop.permute.xlu0 %94  ;;  %vm464_vm15 = vmand %vm144_vm11, %vm336_vm12  ;;  %vm145_vm11 = vcmp.ge.s32.totalorder %v2389_v24, %v2405_v26 }
  0x9e   :  { %vm632_vm0 = vmpackc.low %vm464_vm15, %vm2407_vm6  ;;  %vm337_vm6 = vcmp.lt.s32.totalorder %v2389_v24, %v2419_v29 }
  0x9f   :  { %v2448_v34 = vpop.permute.xlu1 %97  ;;  %v696_v35 = vsel %vm632_vm0, %v2424_v30, 0  ;;  %vm466_vm3 = vmand %vm146_vm1, %vm338_vm13 }
  0xa0   :  { %1303 = vmatprep.mubr.bf16.mxu0 %v696_v35  ;;  %vm634_vm4 = vmpackc.low %vm466_vm3, %vm2415_vm9 }
  0xa1   :  { %v698_v36 = vsel %vm634_vm4, %v2424_v30, 0  ;;  %v2458_v37 = vpop.permute.xlu0 %286  ;;  %vm463_vm7 = vmand %vm143_vm5, %vm335_vm2  ;;  %vm154_vm5 = vcmp.ge.s32.totalorder %v2384_v22, %v2440_v33 }
  0xa2   :  { %1400 = vmatprep.mubr.bf16.mxu1 %v698_v36  ;;  %vm631_vm8 = vmpackc.low %vm463_vm7, %vm2426_vm10  ;;  %vm344_vm9 = vcmp.lt.s32.totalorder %v2381_v21, %v2458_v37  ;;  %vm152_vm10 = vcmp.ge.s32.totalorder %v2381_v21, %v2440_v33  ;;  %vm346_vm1 = vcmp.lt.s32.totalorder %v2384_v22, %v2458_v37  ;;  %v2239_v36 = vld [vmem:[#allocation2 + $0x138] sm:$0xff]  }
  0xa3   :  { %v695_v40 = vsel %vm631_vm8, %v2424_v30, 0  ;;  %vm465_vm12 = vmand %vm145_vm11, %vm337_vm6  ;;  %v2467_v41 = vpop.permute.xlu1 %289  ;;  %vm162_vm6 = vcmp.ge.s32.totalorder %v2384_v22, %v2448_v34  ;;  %vm343_vm8 = vcmp.lt.s32.totalorder %v2378_v20, %v2458_v37 }
  0xa4   :  { %1304 = vmatmul.mubr.bf16.vlgmr.msra.gmra.mrb[0].mxu0 %v695_v40  ;;  %vm633_vm13 = vmpackc.low %vm465_vm12, %vm2436_vm14  ;;  %vm352_vm15 = vcmp.lt.s32.totalorder %v2381_v21, %v2467_v41  ;;  %vm160_vm14 = vcmp.ge.s32.totalorder %v2381_v21, %v2448_v34  ;;  %vm354_vm3 = vcmp.lt.s32.totalorder %v2384_v22, %v2467_v41 }
  0xa5   :  { %v697_v45 = vsel %vm633_vm13, %v2424_v30, 0  ;;  %2036 = vmatpush3.bf16.msra.mxu0 %v2204_v38  ;;  %v2481_v46 = vpop.permute.xlu0 %100  ;;  %vm472_vm0 = vmand %vm152_vm10, %vm344_vm9  ;;  %vm351_vm9 = vcmp.lt.s32.totalorder %v2378_v20, %v2467_v41  ;;  %vm151_vm13 = vcmp.ge.s32.totalorder %v2378_v20, %v2440_v33  ;;  %vm159_vm10 = vcmp.ge.s32.totalorder %v2378_v20, %v2448_v34 }
  0xa6   :  { %1401 = vmatmul.mubr.bf16.vlgmr.msra.gmra.mrb[0].mxu1 %v697_v45  ;;  %vm480_vm2 = vmand %vm160_vm14, %vm352_vm15  ;;  %2037 = vmatprep.subr.bf16.mxu0 %v2208_v39  ;;  %vm345_vm14 = vcmp.lt.s32.totalorder %v2389_v24, %v2458_v37  ;;  %v2241_v39 = vld [vmem:[#allocation2 + $0x1b8] sm:$0xff]  }
  0xa7   :  { %2100 = vmatpush3.bf16.msra.mxu1 %v2206_v42  ;;  %v2492_v49 = vpop.permute.xlu1 %103  ;;  %vm640_vm4 = vmpackc.low %vm480_vm2, %vm472_vm0 }
  0xa8   :  { %v704_v51 = vsel %vm640_vm4, %v2478_v43, 0  ;;  %vm474_vm7 = vmand %vm154_vm5, %vm346_vm1  ;;  %2101 = vmatprep.subr.bf16.mxu1 %v2210_v44  ;;  %vm353_vm1 = vcmp.lt.s32.totalorder %v2389_v24, %v2467_v41  ;;  %vm161_vm4 = vcmp.ge.s32.totalorder %v2389_v24, %v2448_v34 }
  0xa9   :  { %1311 = vmatprep.mubr.bf16.mxu0 %v704_v51  ;;  %vm482_vm11 = vmand %vm162_vm6, %vm354_vm3  ;;  %2038 = vmatpush3.bf16.msra.mxu0 %v2209_v47  ;;  %v2506_v56 = vpop.permute.xlu0 %292  ;;  %vm153_vm3 = vcmp.ge.s32.totalorder %v2389_v24, %v2440_v33 }
  0xaa   :  { %vm642_vm12 = vmpackc.low %vm482_vm11, %vm474_vm7  ;;  %2039 = vmatprep.subr.bf16.mxu0 %v2213_v48  ;;  %vm360_vm6 = vcmp.lt.s32.totalorder %v2381_v21, %v2506_v56  ;;  %v2661_v48 = vld [vmem:[%s3204_s0 + $0x20] sm:$0xff]  }
  0xab   :  { %v706_v55 = vsel %vm642_vm12, %v2478_v43, 0  ;;  %vm471_vm15 = vmand %vm151_vm13, %vm343_vm8  ;;  %2102 = vmatpush3.bf16.msra.mxu1 %v2211_v50  ;;  %v2520_v58 = vpop.permute.xlu1 %295  ;;  %vm176_vm12 = vcmp.ge.s32.totalorder %v2381_v21, %v2492_v49 }
  0xac   :  { %1408 = vmatprep.mubr.bf16.mxu1 %v706_v55  ;;  %vm479_vm0 = vmand %vm159_vm10, %vm351_vm9  ;;  %2103 = vmatprep.subr.bf16.mxu1 %v2215_v53  ;;  %vm368_vm8 = vcmp.lt.s32.totalorder %v2381_v21, %v2520_v58  ;;  %vm168_vm9 = vcmp.ge.s32.totalorder %v2381_v21, %v2481_v46  ;;  %vm362_vm10 = vcmp.lt.s32.totalorder %v2384_v22, %v2506_v56 }
  0xad   :  { %vm639_vm2 = vmpackc.low %vm479_vm0, %vm471_vm15  ;;  %2040 = vmatpush3.bf16.msra.mxu0 %v2214_v52  ;;  %v2542_v3 = vpop.permute.xlu0 %106 }
  0xae   :  { %v703_v61 = vsel %vm639_vm2, %v2478_v43, 0  ;;  %vm473_vm5 = vmand %vm153_vm3, %vm345_vm14  ;;  %2041 = vmatprep.subr.bf16.mxu0 %v2218_v54  ;;  %vm370_vm14 = vcmp.lt.s32.totalorder %v2384_v22, %v2520_v58  ;;  %vm178_vm2 = vcmp.ge.s32.totalorder %v2384_v22, %v2492_v49 }
  0xaf   :  { %1312 = vmatmul.mubr.bf16.gmra.mrb[4].mxu0 %v703_v61  ;;  %vm481_vm7 = vmand %vm161_vm4, %vm353_vm1  ;;  %2104 = vmatpush3.bf16.msra.mxu1 %v2216_v57  ;;  %v2551_v5 = vpop.permute.xlu1 %109  ;;  %vm170_vm1 = vcmp.ge.s32.totalorder %v2384_v22, %v2481_v46  ;;  %vm359_vm4 = vcmp.lt.s32.totalorder %v2378_v20, %v2506_v56 }
  0xb0   :  { %vm641_vm11 = vmpackc.low %vm481_vm7, %vm473_vm5  ;;  %2105 = vmatprep.subr.bf16.mxu1 %v2220_v59 }
  0xb1   :  { %v705_v2 = vsel %vm641_vm11, %v2478_v43, 0  ;;  %vm488_vm13 = vmand %vm168_vm9, %vm360_vm6  ;;  %2042 = vmatpush3.bf16.msra.mxu0 %v2219_v60  ;;  %vm367_vm6 = vcmp.lt.s32.totalorder %v2378_v20, %v2520_v58  ;;  %v2573_v13 = vpop.permute.xlu0 %298  ;;  %vm175_vm11 = vcmp.ge.s32.totalorder %v2378_v20, %v2492_v49  ;;  %v2710_v60 = vld [vmem:[%s3204_s0 + $0x28] sm:$0xff]  }
  0xb2   :  { %1409 = vmatmul.mubr.bf16.gmra.mrb[4].mxu1 %v705_v2  ;;  %vm496_vm15 = vmand %vm176_vm12, %vm368_vm8  ;;  %2043 = vmatprep.subr.bf16.mxu0 %v2223_v63  ;;  %vm167_vm8 = vcmp.ge.s32.totalorder %v2378_v20, %v2481_v46  ;;  %vm361_vm12 = vcmp.lt.s32.totalorder %v2389_v24, %v2506_v56 }
  0xb3   :  { %vm648_vm0 = vmpackc.low %vm496_vm15, %vm488_vm13  ;;  %2106 = vmatpush3.bf16.msra.mxu1 %v2221_v62  ;;  %v2587_v15 = vpop.permute.xlu1 %301 }
  0xb4   :  { %v712_v8 = vsel %vm648_vm0, %v2539_v0, 0  ;;  %vm490_vm3 = vmand %vm170_vm1, %vm362_vm10  ;;  %2107 = vmatprep.subr.bf16.mxu1 %v2225_v1  ;;  %vm369_vm10 = vcmp.lt.s32.totalorder %v2389_v24, %v2520_v58  ;;  %vm177_vm0 = vcmp.ge.s32.totalorder %v2389_v24, %v2492_v49 }
  0xb5   :  { %1319 = vmatprep.mubr.bf16.mxu0 %v712_v8  ;;  %vm498_vm5 = vmand %vm178_vm2, %vm370_vm14  ;;  %2044 = vmatpush3.bf16.msra.mxu0 %v2224_v4  ;;  %vm169_vm14 = vcmp.ge.s32.totalorder %v2389_v24, %v2481_v46  ;;  %vm376_vm2 = vcmp.lt.s32.totalorder %v2381_v21, %v2573_v13  ;;  %v2609_v35 = vpop.permute.xlu0 %112  ;;  %v2759_v8 = vld [vmem:[%s3204_s0 + $0x30] sm:$0xff]  }
  0xb6   :  { %vm650_vm7 = vmpackc.low %vm498_vm5, %vm490_vm3  ;;  %2045 = vmatprep.subr.bf16.mxu0 %v2228_v6 }
  0xb7   :  { %v714_v12 = vsel %vm650_vm7, %v2539_v0, 0  ;;  %vm487_vm9 = vmand %vm167_vm8, %vm359_vm4  ;;  %2108 = vmatpush3.bf16.msra.mxu1 %v2226_v7  ;;  %vm384_vm4 = vcmp.lt.s32.totalorder %v2381_v21, %v2587_v15  ;;  %vm192_vm7 = vcmp.ge.s32.totalorder %v2381_v21, %v2551_v5  ;;  %v2618_v38 = vpop.permute.xlu1 %115 }
  0xb8   :  { %1416 = vmatprep.mubr.bf16.mxu1 %v714_v12  ;;  %vm495_vm13 = vmand %vm175_vm11, %vm367_vm6  ;;  %2109 = vmatprep.subr.bf16.mxu1 %v2230_v10  ;;  %vm184_vm6 = vcmp.ge.s32.totalorder %v2381_v21, %v2542_v3  ;;  %vm378_vm11 = vcmp.lt.s32.totalorder %v2384_v22, %v2573_v13 }
  0xb9   :  { %vm647_vm15 = vmpackc.low %vm495_vm13, %vm487_vm9  ;;  %2046 = vmatpush3.bf16.msra.mxu0 %v2229_v9  ;;  %v2637_v44 = vpop.permute.xlu0 %304 }
  0xba   :  { %v711_v18 = vsel %vm647_vm15, %v2539_v0, 0  ;;  %vm489_vm1 = vmand %vm169_vm14, %vm361_vm12  ;;  %2047 = vmatprep.subr.bf16.mxu0 %v2233_v11  ;;  %vm386_vm12 = vcmp.lt.s32.totalorder %v2384_v22, %v2587_v15  ;;  %vm194_vm15 = vcmp.ge.s32.totalorder %v2384_v22, %v2551_v5 }
  0xbb   :  { %1320 = vmatmul.mubr.bf16.gmra.mrb[8].mxu0 %v711_v18  ;;  %vm497_vm3 = vmand %vm177_vm0, %vm369_vm10  ;;  %2110 = vmatpush3.bf16.msra.mxu1 %v2231_v14  ;;  %vm186_vm10 = vcmp.ge.s32.totalorder %v2384_v22, %v2542_v3  ;;  %vm375_vm0 = vcmp.lt.s32.totalorder %v2378_v20, %v2573_v13  ;;  %v2645_v45 = vpop.permute.xlu1 %307 }
  0xbc   :  { %vm649_vm5 = vmpackc.low %vm497_vm3, %vm489_vm1  ;;  %2111 = vmatprep.subr.bf16.mxu1 %v2235_v16 }
  0xbd   :  { %v713_v32 = vsel %vm649_vm5, %v2539_v0, 0  ;;  %vm504_vm8 = vmand %vm184_vm6, %vm376_vm2  ;;  %2048 = vmatpush3.bf16.msra.mxu0 %v2234_v17  ;;  %vm383_vm2 = vcmp.lt.s32.totalorder %v2378_v20, %v2587_v15  ;;  %vm191_vm5 = vcmp.ge.s32.totalorder %v2378_v20, %v2551_v5  ;;  %v2664_v51 = vpop.permute.xlu0 %118 }
  0xbe   :  { %1417 = vmatmul.mubr.bf16.gmra.mrb[8].mxu1 %v713_v32  ;;  %vm512_vm9 = vmand %vm192_vm7, %vm384_vm4  ;;  %2049 = vmatprep.subr.bf16.mxu0 %v2238_v27  ;;  %vm183_vm4 = vcmp.ge.s32.totalorder %v2378_v20, %v2542_v3  ;;  %vm377_vm7 = vcmp.lt.s32.totalorder %v2389_v24, %v2573_v13 }
  0xbf   :  { %vm656_vm13 = vmpackc.low %vm512_vm9, %vm504_vm8  ;;  %2112 = vmatpush3.bf16.msra.mxu1 %v2236_v19  ;;  %v2670_v52 = vpop.permute.xlu1 %121  ;;  %v2808_v19 = vld [vmem:[%s3204_s0 + $0x38] sm:$0xff]   ;;  %s2294_s0 = smov [#allocation5]  }
  0xc0   :  { %v720_v40 = vsel %vm656_vm13, %v2606_v28, 0  ;;  %vm506_vm14 = vmand %vm186_vm10, %vm378_vm11  ;;  %2113 = vmatprep.subr.bf16.mxu1 %v2240_v31  ;;  %vm385_vm11 = vcmp.lt.s32.totalorder %v2389_v24, %v2587_v15  ;;  %vm193_vm13 = vcmp.ge.s32.totalorder %v2389_v24, %v2551_v5  ;;  %s1744_s19 = sshll.u32 %s2294_s0, 4  ;;  %s1745_s19 = int_to_ptr.vmem [resolvable:$true] %s1744_s19 }
  0xc1   :  { %1327 = vmatprep.mubr.bf16.mxu0 %v720_v40  ;;  %vm514_vm1 = vmand %vm194_vm15, %vm386_vm12  ;;  %2050 = vmatpush3.bf16.msra.mxu0 %v2239_v36  ;;  %vm185_vm12 = vcmp.ge.s32.totalorder %v2389_v24, %v2542_v3  ;;  %vm392_vm15 = vcmp.lt.s32.totalorder %v2381_v21, %v2637_v44  ;;  %v2686_v55 = vpop.permute.xlu0 %310  ;;  %s2264_s20 = scalar_lea.vmem %s1745_s19, 1024  ;;  %p2269_p9 = scmp.lt.s32.totalorder %s1745_s19, %s1745_s19 }
  0xc2   :  { %vm658_vm3 = vmpackc.low %vm514_vm1, %vm506_vm14  ;;  %p2265_p8 = scmp.ne.s32.totalorder %s1745_s19, %s2264_s20  ;;  %p2270_p10 = scmp.lt.s32.totalorder %s2264_s20, %s2264_s20 }
  0xc3   :  { %v722_v42 = vsel %vm658_vm3, %v2606_v28, 0  ;;  %vm503_vm6 = vmand %vm183_vm4, %vm375_vm0  ;;  %2114 = vmatpush3.bf16.msra.mxu1 %v2241_v39  ;;  %vm400_vm0 = vcmp.lt.s32.totalorder %v2381_v21, %v2645_v45  ;;  %vm208_vm3 = vcmp.ge.s32.totalorder %v2381_v21, %v2618_v38  ;;  %v2694_v57 = vpop.permute.xlu1 %313  ;;  %v2853_v39 = vadd.s32 512, %v2378_v20 }
  0xc4   :  { %1424 = vmatprep.mubr.bf16.mxu1 %v722_v42  ;;  %vm511_vm8 = vmand %vm191_vm5, %vm383_vm2  ;;  %vm200_vm2 = vcmp.ge.s32.totalorder %v2381_v21, %v2609_v35  ;;  %vm394_vm5 = vcmp.lt.s32.totalorder %v2384_v22, %v2637_v44  ;;  %p2271_p11 = por %p2270_p10, %p2269_p9 }
  0xc5   :  { %vm655_vm9 = vmpackc.low %vm511_vm8, %vm503_vm6  ;;  %v2713_v62 = vpop.permute.xlu0 %124 }
  0xc6   :  { %v719_v47 = vsel %vm655_vm9, %v2606_v28, 0  ;;  %vm505_vm10 = vmand %vm185_vm12, %vm377_vm7  ;;  %vm402_vm7 = vcmp.lt.s32.totalorder %v2384_v22, %v2645_v45  ;;  %vm210_vm9 = vcmp.ge.s32.totalorder %v2384_v22, %v2618_v38  ;;  %p2272_p12 = pnand %p2271_p11, %p2265_p8 }
  0xc7   :  { %1328 = vmatmul.mubr.bf16.gmra.mrb[12].mxu0 %v719_v47  ;;  %vm513_vm14 = vmand %vm193_vm13, %vm385_vm11  ;;  %vm202_vm11 = vcmp.ge.s32.totalorder %v2384_v22, %v2609_v35  ;;  %vm391_vm13 = vcmp.lt.s32.totalorder %v2378_v20, %v2637_v44  ;;  %v2719_v63 = vpop.permute.xlu1 %127 }
  0xc8   :  { %vm657_vm1 = vmpackc.low %vm513_vm14, %vm505_vm10 }
  0xc9   :  { %v721_v50 = vsel %vm657_vm1, %v2606_v28, 0  ;;  %vm520_vm4 = vmand %vm200_vm2, %vm392_vm15  ;;  %vm399_vm15 = vcmp.lt.s32.totalorder %v2378_v20, %v2645_v45  ;;  %vm207_vm1 = vcmp.ge.s32.totalorder %v2378_v20, %v2618_v38  ;;  %v2735_v4 = vpop.permute.xlu0 %316 }
  0xca   :  { %1425 = vmatmul.mubr.bf16.gmra.mrb[12].mxu1 %v721_v50  ;;  %vm528_vm6 = vmand %vm208_vm3, %vm400_vm0  ;;  %vm199_vm0 = vcmp.ge.s32.totalorder %v2378_v20, %v2609_v35  ;;  %vm393_vm3 = vcmp.lt.s32.totalorder %v2389_v24, %v2637_v44 }
  0xcb   :  { %vm664_vm8 = vmpackc.low %vm528_vm6, %vm520_vm4  ;;  %v2743_v6 = vpop.permute.xlu1 %319 }
  0xcc   :  { %v728_v53 = vsel %vm664_vm8, %v2661_v48, 0  ;;  %vm522_vm12 = vmand %vm202_vm11, %vm394_vm5  ;;  %vm401_vm5 = vcmp.lt.s32.totalorder %v2389_v24, %v2645_v45  ;;  %vm209_vm8 = vcmp.ge.s32.totalorder %v2389_v24, %v2618_v38 }
  0xcd   :  { %1335 = vmatprep.mubr.bf16.mxu0 %v728_v53  ;;  %vm530_vm10 = vmand %vm210_vm9, %vm402_vm7  ;;  %vm201_vm7 = vcmp.ge.s32.totalorder %v2389_v24, %v2609_v35  ;;  %vm408_vm9 = vcmp.lt.s32.totalorder %v2381_v21, %v2686_v55  ;;  %v2762_v10 = vpop.permute.xlu0 %130 }
  0xce   :  { %vm666_vm14 = vmpackc.low %vm530_vm10, %vm522_vm12 }
  0xcf   :  { %v730_v54 = vsel %vm666_vm14, %v2661_v48, 0  ;;  %vm519_vm2 = vmand %vm199_vm0, %vm391_vm13  ;;  %vm416_vm13 = vcmp.lt.s32.totalorder %v2381_v21, %v2694_v57  ;;  %vm224_vm14 = vcmp.ge.s32.totalorder %v2381_v21, %v2670_v52  ;;  %v2768_v11 = vpop.permute.xlu1 %133 }
  0xd0   :  { %1432 = vmatprep.mubr.bf16.mxu1 %v730_v54  ;;  %vm527_vm4 = vmand %vm207_vm1, %vm399_vm15  ;;  %vm216_vm15 = vcmp.ge.s32.totalorder %v2381_v21, %v2664_v51  ;;  %vm410_vm1 = vcmp.lt.s32.totalorder %v2384_v22, %v2686_v55 }
  0xd1   :  { %vm663_vm6 = vmpackc.low %vm527_vm4, %vm519_vm2  ;;  %v2784_v16 = vpop.permute.xlu0 %322 }
  0xd2   :  { %v727_v59 = vsel %vm663_vm6, %v2661_v48, 0  ;;  %vm521_vm11 = vmand %vm201_vm7, %vm393_vm3  ;;  %vm418_vm3 = vcmp.lt.s32.totalorder %v2384_v22, %v2694_v57  ;;  %vm226_vm6 = vcmp.ge.s32.totalorder %v2384_v22, %v2670_v52 }
  0xd3   :  { %1336 = vmatmul.mubr.bf16.gmra.mrb[16].mxu0 %v727_v59  ;;  %vm529_vm12 = vmand %vm209_vm8, %vm401_vm5  ;;  %vm218_vm5 = vcmp.ge.s32.totalorder %v2384_v22, %v2664_v51  ;;  %vm407_vm8 = vcmp.lt.s32.totalorder %v2378_v20, %v2686_v55  ;;  %v2792_v17 = vpop.permute.xlu1 %325 }
  0xd4   :  { %vm665_vm10 = vmpackc.low %vm529_vm12, %vm521_vm11 }
  0xd5   :  { %v729_v61 = vsel %vm665_vm10, %v2661_v48, 0  ;;  %vm536_vm0 = vmand %vm216_vm15, %vm408_vm9  ;;  %vm415_vm9 = vcmp.lt.s32.totalorder %v2378_v20, %v2694_v57  ;;  %vm223_vm10 = vcmp.ge.s32.totalorder %v2378_v20, %v2670_v52 }
  0xd6   :  { %1433 = vmatmul.mubr.bf16.gmra.mrb[16].mxu1 %v729_v61  ;;  %vm544_vm2 = vmand %vm224_vm14, %vm416_vm13  ;;  %vm215_vm13 = vcmp.ge.s32.totalorder %v2378_v20, %v2664_v51  ;;  %vm409_vm14 = vcmp.lt.s32.totalorder %v2389_v24, %v2686_v55 }
  0xd7   :  { %vm672_vm4 = vmpackc.low %vm544_vm2, %vm536_vm0 }
  0xd8   :  { %v736_v1 = vsel %vm672_vm4, %v2710_v60, 0  ;;  %vm538_vm7 = vmand %vm218_vm5, %vm410_vm1  ;;  %vm417_vm1 = vcmp.lt.s32.totalorder %v2389_v24, %v2694_v57  ;;  %vm225_vm4 = vcmp.ge.s32.totalorder %v2389_v24, %v2670_v52 }
  0xd9   :  { %1343 = vmatprep.mubr.bf16.mxu0 %v736_v1  ;;  %vm546_vm11 = vmand %vm226_vm6, %vm418_vm3  ;;  %vm217_vm3 = vcmp.ge.s32.totalorder %v2389_v24, %v2664_v51  ;;  %vm424_vm6 = vcmp.lt.s32.totalorder %v2381_v21, %v2735_v4 }
  0xda   :  { %vm674_vm12 = vmpackc.low %vm546_vm11, %vm538_vm7 }
  0xdb   :  { %v738_v2 = vsel %vm674_vm12, %v2710_v60, 0  ;;  %vm535_vm15 = vmand %vm215_vm13, %vm407_vm8  ;;  %vm432_vm8 = vcmp.lt.s32.totalorder %v2381_v21, %v2743_v6  ;;  %vm240_vm12 = vcmp.ge.s32.totalorder %v2381_v21, %v2719_v63 }
  0xdc   :  { %1440 = vmatprep.mubr.bf16.mxu1 %v738_v2  ;;  %vm543_vm0 = vmand %vm223_vm10, %vm415_vm9  ;;  %vm232_vm9 = vcmp.ge.s32.totalorder %v2381_v21, %v2713_v62  ;;  %vm426_vm10 = vcmp.lt.s32.totalorder %v2384_v22, %v2735_v4 }
  0xdd   :  { %vm671_vm2 = vmpackc.low %vm543_vm0, %vm535_vm15 }
  0xde   :  { %v735_v7 = vsel %vm671_vm2, %v2710_v60, 0  ;;  %vm537_vm5 = vmand %vm217_vm3, %vm409_vm14  ;;  %vm434_vm14 = vcmp.lt.s32.totalorder %v2384_v22, %v2743_v6  ;;  %vm242_vm2 = vcmp.ge.s32.totalorder %v2384_v22, %v2719_v63 }
  0xdf   :  { %1344 = vmatmul.mubr.bf16.gmra.mrb[20].mxu0 %v735_v7  ;;  %vm545_vm7 = vmand %vm225_vm4, %vm417_vm1  ;;  %vm234_vm1 = vcmp.ge.s32.totalorder %v2384_v22, %v2713_v62  ;;  %vm423_vm4 = vcmp.lt.s32.totalorder %v2378_v20, %v2735_v4 }
  0xe0   :  { %vm673_vm11 = vmpackc.low %vm545_vm7, %vm537_vm5 }
  0xe1   :  { %v737_v9 = vsel %vm673_vm11, %v2710_v60, 0  ;;  %vm552_vm13 = vmand %vm232_vm9, %vm424_vm6  ;;  %vm431_vm6 = vcmp.lt.s32.totalorder %v2378_v20, %v2743_v6  ;;  %vm239_vm11 = vcmp.ge.s32.totalorder %v2378_v20, %v2719_v63 }
  0xe2   :  { %1441 = vmatmul.mubr.bf16.gmra.mrb[20].mxu1 %v737_v9  ;;  %vm560_vm15 = vmand %vm240_vm12, %vm432_vm8  ;;  %vm231_vm8 = vcmp.ge.s32.totalorder %v2378_v20, %v2713_v62  ;;  %vm425_vm12 = vcmp.lt.s32.totalorder %v2389_v24, %v2735_v4 }
  0xe3   :  { %vm680_vm0 = vmpackc.low %vm560_vm15, %vm552_vm13 }
  0xe4   :  { %v744_v12 = vsel %vm680_vm0, %v2759_v8, 0  ;;  %vm554_vm3 = vmand %vm234_vm1, %vm426_vm10  ;;  %vm433_vm10 = vcmp.lt.s32.totalorder %v2389_v24, %v2743_v6  ;;  %vm241_vm0 = vcmp.ge.s32.totalorder %v2389_v24, %v2719_v63 }
  0xe5   :  { %1351 = vmatprep.mubr.bf16.mxu0 %v744_v12  ;;  %vm562_vm5 = vmand %vm242_vm2, %vm434_vm14  ;;  %vm233_vm14 = vcmp.ge.s32.totalorder %v2389_v24, %v2713_v62  ;;  %vm440_vm2 = vcmp.lt.s32.totalorder %v2381_v21, %v2784_v16 }
  0xe6   :  { %vm682_vm7 = vmpackc.low %vm562_vm5, %vm554_vm3 }
  0xe7   :  { %v746_v14 = vsel %vm682_vm7, %v2759_v8, 0  ;;  %vm551_vm9 = vmand %vm231_vm8, %vm423_vm4  ;;  %vm448_vm4 = vcmp.lt.s32.totalorder %v2381_v21, %v2792_v17  ;;  %vm256_vm7 = vcmp.ge.s32.totalorder %v2381_v21, %v2768_v11 }
  0xe8   :  { %1448 = vmatprep.mubr.bf16.mxu1 %v746_v14  ;;  %vm559_vm13 = vmand %vm239_vm11, %vm431_vm6  ;;  %vm248_vm6 = vcmp.ge.s32.totalorder %v2381_v21, %v2762_v10  ;;  %vm442_vm11 = vcmp.lt.s32.totalorder %v2384_v22, %v2784_v16  ;;  %v2829_v21 = vadd.s32 640, %v2378_v20 }
  0xe9   :  { %vm679_vm15 = vmpackc.low %vm559_vm13, %vm551_vm9 }
  0xea   :  { %v743_v18 = vsel %vm679_vm15, %v2759_v8, 0  ;;  %vm553_vm1 = vmand %vm233_vm14, %vm425_vm12  ;;  %vm450_vm12 = vcmp.lt.s32.totalorder %v2384_v22, %v2792_v17  ;;  %vm258_vm15 = vcmp.ge.s32.totalorder %v2384_v22, %v2768_v11 }
  0xeb   :  { %1352 = vmatmul.mubr.bf16.gmra.mrb[24].mxu0 %v743_v18  ;;  %vm561_vm3 = vmand %vm241_vm0, %vm433_vm10  ;;  %vm250_vm10 = vcmp.ge.s32.totalorder %v2384_v22, %v2762_v10  ;;  %vm439_vm0 = vcmp.lt.s32.totalorder %v2378_v20, %v2784_v16  ;;  %v2841_v22 = vadd.s32 896, %v2378_v20 }
  0xec   :  { %vm681_vm5 = vmpackc.low %vm561_vm3, %vm553_vm1 }
  0xed   :  { %v745_v27 = vsel %vm681_vm5, %v2759_v8, 0  ;;  %vm568_vm8 = vmand %vm248_vm6, %vm440_vm2  ;;  %vm447_vm2 = vcmp.lt.s32.totalorder %v2378_v20, %v2792_v17  ;;  %vm255_vm5 = vcmp.ge.s32.totalorder %v2378_v20, %v2768_v11 }
  0xee   :  { %1449 = vmatmul.mubr.bf16.gmra.mrb[24].mxu1 %v745_v27  ;;  %vm576_vm9 = vmand %vm256_vm7, %vm448_vm4  ;;  %vm247_vm4 = vcmp.ge.s32.totalorder %v2378_v20, %v2762_v10  ;;  %vm441_vm7 = vcmp.lt.s32.totalorder %v2389_v24, %v2784_v16 }
  0xef   :  { %vm688_vm13 = vmpackc.low %vm576_vm9, %vm568_vm8 }
  0xf0   :  { %v752_v31 = vsel %vm688_vm13, %v2808_v19, 0  ;;  %vm570_vm14 = vmand %vm250_vm10, %vm442_vm11  ;;  %vm449_vm11 = vcmp.lt.s32.totalorder %v2389_v24, %v2792_v17  ;;  %vm257_vm13 = vcmp.ge.s32.totalorder %v2389_v24, %v2768_v11 }
  0xf1   :  { %1359 = vmatprep.mubr.bf16.mxu0 %v752_v31  ;;  %vm578_vm1 = vmand %vm258_vm15, %vm450_vm12  ;;  %vm249_vm12 = vcmp.ge.s32.totalorder %v2389_v24, %v2762_v10  ;;  %vm140_vm15 = vcmp.ge.s32.totalorder %v2829_v21, %v2386_v23  ;;  %v2865_v24 = vadd.s32 768, %v2378_v20 }
  0xf2   :  { %vm690_vm3 = vmpackc.low %vm578_vm1, %vm570_vm14  ;;  %vm332_vm14 = vcmp.lt.s32.totalorder %v2829_v21, %v2393_v25  ;;  %vm340_vm1 = vcmp.lt.s32.totalorder %v2829_v21, %v2419_v29 }
  0xf3   :  { %v754_v32 = vsel %vm690_vm3, %v2808_v19, 0  ;;  %vm567_vm6 = vmand %vm247_vm4, %vm439_vm0  ;;  %vm148_vm3 = vcmp.ge.s32.totalorder %v2829_v21, %v2405_v26 }
  0xf4   :  { %1456 = vmatprep.mubr.bf16.mxu1 %v754_v32  ;;  %vm575_vm8 = vmand %vm255_vm5, %vm447_vm2  ;;  %vm142_vm5 = vcmp.ge.s32.totalorder %v2841_v22, %v2386_v23 }
  0xf5   :  { %vm687_vm9 = vmpackc.low %vm575_vm8, %vm567_vm6  ;;  %vm334_vm6 = vcmp.lt.s32.totalorder %v2841_v22, %v2393_v25  ;;  %vm342_vm8 = vcmp.lt.s32.totalorder %v2841_v22, %v2419_v29 }
  0xf6   :  { %v751_v36 = vsel %vm687_vm9, %v2808_v19, 0  ;;  %vm569_vm10 = vmand %vm249_vm12, %vm441_vm7  ;;  %vm150_vm9 = vcmp.ge.s32.totalorder %v2841_v22, %v2405_v26 }
  0xf7   :  { %1360 = vmatmul.mubr.bf16.gmra.mrb[28].mxu0 %v751_v36  ;;  %vm577_vm0 = vmand %vm257_vm13, %vm449_vm11  ;;  %vm139_vm13 = vcmp.ge.s32.totalorder %v2853_v39, %v2386_v23 }
  0xf8   :  { %vm689_vm2 = vmpackc.low %vm577_vm0, %vm569_vm10  ;;  %vm331_vm10 = vcmp.lt.s32.totalorder %v2853_v39, %v2393_v25 }
  0xf9   :  { %v753_v40 = vsel %vm689_vm2, %v2808_v19, 0  ;;  %vm460_vm4 = vmand %vm140_vm15, %vm332_vm14  ;;  %vm339_vm14 = vcmp.lt.s32.totalorder %v2853_v39, %v2419_v29 }
  0xfa   :  { %1457 = vmatmul.mubr.bf16.gmra.mrb[28].mxu1 %v753_v40  ;;  %vm468_vm7 = vmand %vm148_vm3, %vm340_vm1  ;;  %vm147_vm1 = vcmp.ge.s32.totalorder %v2853_v39, %v2405_v26  ;;  %vm141_vm3 = vcmp.ge.s32.totalorder %v2865_v24, %v2386_v23 }
  0xfb   :  { %vm636_vm11 = vmpackc.low %vm468_vm7, %vm460_vm4  ;;  %vm333_vm4 = vcmp.lt.s32.totalorder %v2865_v24, %v2393_v25 }
  0xfc   :  { %v700_v42 = vsel %vm636_vm11, %v2424_v30, 0  ;;  %vm462_vm12 = vmand %vm142_vm5, %vm334_vm6  ;;  %vm341_vm6 = vcmp.lt.s32.totalorder %v2865_v24, %v2419_v29 }
  0xfd   :  { %1497 = vmatprep.mubr.bf16.mxu0 %v700_v42  ;;  %vm470_vm15 = vmand %vm150_vm9, %vm342_vm8  ;;  %vm149_vm8 = vcmp.ge.s32.totalorder %v2865_v24, %v2405_v26  ;;  %vm348_vm9 = vcmp.lt.s32.totalorder %v2829_v21, %v2458_v37 }
  0xfe   :  { %vm638_vm0 = vmpackc.low %vm470_vm15, %vm462_vm12  ;;  %vm156_vm15 = vcmp.ge.s32.totalorder %v2829_v21, %v2440_v33 }
  0xff   :  { %v702_v20 = vsel %vm638_vm0, %v2424_v30, 0  ;;  %vm459_vm2 = vmand %vm139_vm13, %vm331_vm10  ;;  %vm356_vm13 = vcmp.lt.s32.totalorder %v2829_v21, %v2467_v41 }
 0x100   :  { %1594 = vmatprep.mubr.bf16.mxu1 %v702_v20  ;;  %vm467_vm5 = vmand %vm147_vm1, %vm339_vm14  ;;  %vm164_vm14 = vcmp.ge.s32.totalorder %v2829_v21, %v2448_v34  ;;  %vm350_vm1 = vcmp.lt.s32.totalorder %v2841_v22, %v2458_v37 }
 0x101   :  { %vm635_vm7 = vmpackc.low %vm467_vm5, %vm459_vm2  ;;  %vm158_vm5 = vcmp.ge.s32.totalorder %v2841_v22, %v2440_v33 }
 0x102   :  { %v699_v47 = vsel %vm635_vm7, %v2424_v30, 0  ;;  %vm461_vm11 = vmand %vm141_vm3, %vm333_vm4  ;;  %vm358_vm3 = vcmp.lt.s32.totalorder %v2841_v22, %v2467_v41 }
 0x103   :  { %1498 = vmatmul.mubr.bf16.vlgmr.msra.gmra.mrb[32].mxu0 %v699_v47  ;;  %vm469_vm12 = vmand %vm149_vm8, %vm341_vm6  ;;  %vm166_vm6 = vcmp.ge.s32.totalorder %v2841_v22, %v2448_v34  ;;  %vm347_vm8 = vcmp.lt.s32.totalorder %v2853_v39, %v2458_v37 }
 0x104   :  { %vm637_vm10 = vmpackc.low %vm469_vm12, %vm461_vm11 }
 0x105   :  { %v701_v23 = vsel %vm637_vm10, %v2424_v30, 0  ;;  %vm476_vm0 = vmand %vm156_vm15, %vm348_vm9  ;;  %vm355_vm9 = vcmp.lt.s32.totalorder %v2853_v39, %v2467_v41  ;;  %vm163_vm10 = vcmp.ge.s32.totalorder %v2853_v39, %v2448_v34 }
 0x106   :  { %1595 = vmatmul.mubr.bf16.vlgmr.msra.gmra.mrb[32].mxu1 %v701_v23  ;;  %vm484_vm2 = vmand %vm164_vm14, %vm356_vm13  ;;  %vm155_vm13 = vcmp.ge.s32.totalorder %v2853_v39, %v2440_v33  ;;  %vm349_vm14 = vcmp.lt.s32.totalorder %v2865_v24, %v2458_v37 }
 0x107   :  { %vm644_vm4 = vmpackc.low %vm484_vm2, %vm476_vm0 }
 0x108   :  { %v708_v25 = vsel %vm644_vm4, %v2478_v43, 0  ;;  %vm478_vm7 = vmand %vm158_vm5, %vm350_vm1  ;;  %vm357_vm1 = vcmp.lt.s32.totalorder %v2865_v24, %v2467_v41  ;;  %vm165_vm4 = vcmp.ge.s32.totalorder %v2865_v24, %v2448_v34 }
 0x109   :  { %1505 = vmatprep.mubr.bf16.mxu0 %v708_v25  ;;  %vm486_vm11 = vmand %vm166_vm6, %vm358_vm3  ;;  %vm157_vm3 = vcmp.ge.s32.totalorder %v2865_v24, %v2440_v33  ;;  %vm364_vm6 = vcmp.lt.s32.totalorder %v2829_v21, %v2506_v56 }
 0x10a   :  { %vm646_vm12 = vmpackc.low %vm486_vm11, %vm478_vm7 }
 0x10b   :  { %v710_v26 = vsel %vm646_vm12, %v2478_v43, 0  ;;  %vm475_vm15 = vmand %vm155_vm13, %vm347_vm8  ;;  %vm372_vm8 = vcmp.lt.s32.totalorder %v2829_v21, %v2520_v58  ;;  %vm180_vm12 = vcmp.ge.s32.totalorder %v2829_v21, %v2492_v49 }
 0x10c   :  { %1602 = vmatprep.mubr.bf16.mxu1 %v710_v26  ;;  %vm483_vm0 = vmand %vm163_vm10, %vm355_vm9  ;;  %vm172_vm9 = vcmp.ge.s32.totalorder %v2829_v21, %v2481_v46  ;;  %vm366_vm10 = vcmp.lt.s32.totalorder %v2841_v22, %v2506_v56 }
 0x10d   :  { %vm643_vm2 = vmpackc.low %vm483_vm0, %vm475_vm15 }
 0x10e   :  { %v707_v29 = vsel %vm643_vm2, %v2478_v43, 0  ;;  %vm477_vm5 = vmand %vm157_vm3, %vm349_vm14  ;;  %vm374_vm14 = vcmp.lt.s32.totalorder %v2841_v22, %v2520_v58  ;;  %vm182_vm2 = vcmp.ge.s32.totalorder %v2841_v22, %v2492_v49 }
 0x10f   :  { %1506 = vmatmul.mubr.bf16.gmra.mrb[36].mxu0 %v707_v29  ;;  %vm485_vm7 = vmand %vm165_vm4, %vm357_vm1  ;;  %vm174_vm1 = vcmp.ge.s32.totalorder %v2841_v22, %v2481_v46  ;;  %vm363_vm4 = vcmp.lt.s32.totalorder %v2853_v39, %v2506_v56 }
 0x110   :  { %vm645_vm11 = vmpackc.low %vm485_vm7, %vm477_vm5 }
 0x111   :  { %v709_v30 = vsel %vm645_vm11, %v2478_v43, 0  ;;  %vm492_vm13 = vmand %vm172_vm9, %vm364_vm6  ;;  %vm371_vm6 = vcmp.lt.s32.totalorder %v2853_v39, %v2520_v58  ;;  %vm179_vm11 = vcmp.ge.s32.totalorder %v2853_v39, %v2492_v49 }
 0x112   :  { %1603 = vmatmul.mubr.bf16.gmra.mrb[36].mxu1 %v709_v30  ;;  %vm500_vm15 = vmand %vm180_vm12, %vm372_vm8  ;;  %vm171_vm8 = vcmp.ge.s32.totalorder %v2853_v39, %v2481_v46  ;;  %vm365_vm12 = vcmp.lt.s32.totalorder %v2865_v24, %v2506_v56 }
 0x113   :  { %vm652_vm0 = vmpackc.low %vm500_vm15, %vm492_vm13 }
 0x114   :  { %v716_v33 = vsel %vm652_vm0, %v2539_v0, 0  ;;  %vm494_vm3 = vmand %vm174_vm1, %vm366_vm10  ;;  %vm373_vm10 = vcmp.lt.s32.totalorder %v2865_v24, %v2520_v58  ;;  %vm181_vm0 = vcmp.ge.s32.totalorder %v2865_v24, %v2492_v49 }
 0x115   :  { %1513 = vmatprep.mubr.bf16.mxu0 %v716_v33  ;;  %vm502_vm5 = vmand %vm182_vm2, %vm374_vm14  ;;  %vm173_vm14 = vcmp.ge.s32.totalorder %v2865_v24, %v2481_v46  ;;  %vm380_vm2 = vcmp.lt.s32.totalorder %v2829_v21, %v2573_v13 }
 0x116   :  { %vm654_vm7 = vmpackc.low %vm502_vm5, %vm494_vm3 }
 0x117   :  { %v718_v34 = vsel %vm654_vm7, %v2539_v0, 0  ;;  %vm491_vm9 = vmand %vm171_vm8, %vm363_vm4  ;;  %vm388_vm4 = vcmp.lt.s32.totalorder %v2829_v21, %v2587_v15  ;;  %vm196_vm7 = vcmp.ge.s32.totalorder %v2829_v21, %v2551_v5 }
 0x118   :  { %1610 = vmatprep.mubr.bf16.mxu1 %v718_v34  ;;  %vm499_vm13 = vmand %vm179_vm11, %vm371_vm6  ;;  %vm188_vm6 = vcmp.ge.s32.totalorder %v2829_v21, %v2542_v3  ;;  %vm382_vm11 = vcmp.lt.s32.totalorder %v2841_v22, %v2573_v13 }
 0x119   :  { %vm651_vm15 = vmpackc.low %vm499_vm13, %vm491_vm9 }
 0x11a   :  { %v715_v37 = vsel %vm651_vm15, %v2539_v0, 0  ;;  %vm493_vm1 = vmand %vm173_vm14, %vm365_vm12  ;;  %vm390_vm12 = vcmp.lt.s32.totalorder %v2841_v22, %v2587_v15  ;;  %vm198_vm15 = vcmp.ge.s32.totalorder %v2841_v22, %v2551_v5 }
 0x11b   :  { %1514 = vmatmul.mubr.bf16.gmra.mrb[40].mxu0 %v715_v37  ;;  %vm501_vm3 = vmand %vm181_vm0, %vm373_vm10  ;;  %vm190_vm10 = vcmp.ge.s32.totalorder %v2841_v22, %v2542_v3  ;;  %vm379_vm0 = vcmp.lt.s32.totalorder %v2853_v39, %v2573_v13 }
 0x11c   :  { %vm653_vm5 = vmpackc.low %vm501_vm3, %vm493_vm1 }
 0x11d   :  { %v717_v41 = vsel %vm653_vm5, %v2539_v0, 0  ;;  %vm508_vm8 = vmand %vm188_vm6, %vm380_vm2  ;;  %vm387_vm2 = vcmp.lt.s32.totalorder %v2853_v39, %v2587_v15  ;;  %vm195_vm5 = vcmp.ge.s32.totalorder %v2853_v39, %v2551_v5 }
 0x11e   :  { %1611 = vmatmul.mubr.bf16.gmra.mrb[40].mxu1 %v717_v41  ;;  %vm516_vm9 = vmand %vm196_vm7, %vm388_vm4  ;;  %vm187_vm4 = vcmp.ge.s32.totalorder %v2853_v39, %v2542_v3  ;;  %vm381_vm7 = vcmp.lt.s32.totalorder %v2865_v24, %v2573_v13 }
 0x11f   :  { %vm660_vm13 = vmpackc.low %vm516_vm9, %vm508_vm8 }
 0x120   :  { %v724_v43 = vsel %vm660_vm13, %v2606_v28, 0  ;;  %vm510_vm14 = vmand %vm190_vm10, %vm382_vm11  ;;  %vm389_vm11 = vcmp.lt.s32.totalorder %v2865_v24, %v2587_v15  ;;  %vm197_vm13 = vcmp.ge.s32.totalorder %v2865_v24, %v2551_v5 }
 0x121   :  { %1521 = vmatprep.mubr.bf16.mxu0 %v724_v43  ;;  %vm518_vm1 = vmand %vm198_vm15, %vm390_vm12  ;;  %vm189_vm12 = vcmp.ge.s32.totalorder %v2865_v24, %v2542_v3  ;;  %vm396_vm15 = vcmp.lt.s32.totalorder %v2829_v21, %v2637_v44 }
 0x122   :  { %vm662_vm3 = vmpackc.low %vm518_vm1, %vm510_vm14 }
 0x123   :  { %v726_v46 = vsel %vm662_vm3, %v2606_v28, 0  ;;  %vm507_vm6 = vmand %vm187_vm4, %vm379_vm0  ;;  %vm404_vm0 = vcmp.lt.s32.totalorder %v2829_v21, %v2645_v45  ;;  %vm212_vm3 = vcmp.ge.s32.totalorder %v2829_v21, %v2618_v38 }
 0x124   :  { %1618 = vmatprep.mubr.bf16.mxu1 %v726_v46  ;;  %vm515_vm8 = vmand %vm195_vm5, %vm387_vm2  ;;  %vm204_vm2 = vcmp.ge.s32.totalorder %v2829_v21, %v2609_v35  ;;  %vm398_vm5 = vcmp.lt.s32.totalorder %v2841_v22, %v2637_v44 }
 0x125   :  { %vm659_vm9 = vmpackc.low %vm515_vm8, %vm507_vm6 }
 0x126   :  { %v723_v49 = vsel %vm659_vm9, %v2606_v28, 0  ;;  %vm509_vm10 = vmand %vm189_vm12, %vm381_vm7  ;;  %vm406_vm7 = vcmp.lt.s32.totalorder %v2841_v22, %v2645_v45  ;;  %vm214_vm9 = vcmp.ge.s32.totalorder %v2841_v22, %v2618_v38 }
 0x127   :  { %1522 = vmatmul.mubr.bf16.gmra.mrb[44].mxu0 %v723_v49  ;;  %vm517_vm14 = vmand %vm197_vm13, %vm389_vm11  ;;  %vm206_vm11 = vcmp.ge.s32.totalorder %v2841_v22, %v2609_v35  ;;  %vm395_vm13 = vcmp.lt.s32.totalorder %v2853_v39, %v2637_v44 }
 0x128   :  { %vm661_vm1 = vmpackc.low %vm517_vm14, %vm509_vm10 }
 0x129   :  { %v725_v56 = vsel %vm661_vm1, %v2606_v28, 0  ;;  %vm524_vm4 = vmand %vm204_vm2, %vm396_vm15  ;;  %vm403_vm15 = vcmp.lt.s32.totalorder %v2853_v39, %v2645_v45  ;;  %vm211_vm1 = vcmp.ge.s32.totalorder %v2853_v39, %v2618_v38 }
 0x12a   :  { %1619 = vmatmul.mubr.bf16.gmra.mrb[44].mxu1 %v725_v56  ;;  %vm532_vm6 = vmand %vm212_vm3, %vm404_vm0  ;;  %vm203_vm0 = vcmp.ge.s32.totalorder %v2853_v39, %v2609_v35  ;;  %vm397_vm3 = vcmp.lt.s32.totalorder %v2865_v24, %v2637_v44 }
 0x12b   :  { %vm668_vm8 = vmpackc.low %vm532_vm6, %vm524_vm4 }
 0x12c   :  { %v732_v58 = vsel %vm668_vm8, %v2661_v48, 0  ;;  %vm526_vm12 = vmand %vm206_vm11, %vm398_vm5  ;;  %vm405_vm5 = vcmp.lt.s32.totalorder %v2865_v24, %v2645_v45  ;;  %vm213_vm8 = vcmp.ge.s32.totalorder %v2865_v24, %v2618_v38 }
 0x12d   :  { %1529 = vmatprep.mubr.bf16.mxu0 %v732_v58  ;;  %vm534_vm10 = vmand %vm214_vm9, %vm406_vm7  ;;  %vm205_vm7 = vcmp.ge.s32.totalorder %v2865_v24, %v2609_v35  ;;  %vm412_vm9 = vcmp.lt.s32.totalorder %v2829_v21, %v2686_v55 }
 0x12e   :  { %vm670_vm14 = vmpackc.low %vm534_vm10, %vm526_vm12 }
 0x12f   :  { %v734_v0 = vsel %vm670_vm14, %v2661_v48, 0  ;;  %vm523_vm2 = vmand %vm203_vm0, %vm395_vm13  ;;  %vm420_vm13 = vcmp.lt.s32.totalorder %v2829_v21, %v2694_v57  ;;  %vm228_vm14 = vcmp.ge.s32.totalorder %v2829_v21, %v2670_v52 }
 0x130   :  { %1626 = vmatprep.mubr.bf16.mxu1 %v734_v0  ;;  %vm531_vm4 = vmand %vm211_vm1, %vm403_vm15  ;;  %vm220_vm15 = vcmp.ge.s32.totalorder %v2829_v21, %v2664_v51  ;;  %vm414_vm1 = vcmp.lt.s32.totalorder %v2841_v22, %v2686_v55 }
 0x131   :  { %vm667_vm6 = vmpackc.low %vm531_vm4, %vm523_vm2 }
 0x132   :  { %v731_v3 = vsel %vm667_vm6, %v2661_v48, 0  ;;  %vm525_vm11 = vmand %vm205_vm7, %vm397_vm3  ;;  %vm422_vm3 = vcmp.lt.s32.totalorder %v2841_v22, %v2694_v57  ;;  %vm230_vm6 = vcmp.ge.s32.totalorder %v2841_v22, %v2670_v52 }
 0x133   :  { %1530 = vmatmul.mubr.bf16.gmra.mrb[48].mxu0 %v731_v3  ;;  %vm533_vm12 = vmand %vm213_vm8, %vm405_vm5  ;;  %vm222_vm5 = vcmp.ge.s32.totalorder %v2841_v22, %v2664_v51  ;;  %vm411_vm8 = vcmp.lt.s32.totalorder %v2853_v39, %v2686_v55 }
 0x134   :  { %vm669_vm10 = vmpackc.low %vm533_vm12, %vm525_vm11 }
 0x135   :  { %v733_v5 = vsel %vm669_vm10, %v2661_v48, 0  ;;  %vm540_vm0 = vmand %vm220_vm15, %vm412_vm9  ;;  %vm419_vm9 = vcmp.lt.s32.totalorder %v2853_v39, %v2694_v57  ;;  %vm227_vm10 = vcmp.ge.s32.totalorder %v2853_v39, %v2670_v52 }
 0x136   :  { %1627 = vmatmul.mubr.bf16.gmra.mrb[48].mxu1 %v733_v5  ;;  %vm548_vm2 = vmand %vm228_vm14, %vm420_vm13  ;;  %vm219_vm13 = vcmp.ge.s32.totalorder %v2853_v39, %v2664_v51  ;;  %vm413_vm14 = vcmp.lt.s32.totalorder %v2865_v24, %v2686_v55 }
 0x137   :  { %vm676_vm4 = vmpackc.low %vm548_vm2, %vm540_vm0 }
 0x138   :  { %v740_v13 = vsel %vm676_vm4, %v2710_v60, 0  ;;  %vm542_vm7 = vmand %vm222_vm5, %vm414_vm1  ;;  %vm421_vm1 = vcmp.lt.s32.totalorder %v2865_v24, %v2694_v57  ;;  %vm229_vm4 = vcmp.ge.s32.totalorder %v2865_v24, %v2670_v52 }
 0x139   :  { %1537 = vmatprep.mubr.bf16.mxu0 %v740_v13  ;;  %vm550_vm11 = vmand %vm230_vm6, %vm422_vm3  ;;  %vm221_vm3 = vcmp.ge.s32.totalorder %v2865_v24, %v2664_v51  ;;  %vm428_vm6 = vcmp.lt.s32.totalorder %v2829_v21, %v2735_v4 }
 0x13a   :  { %vm678_vm12 = vmpackc.low %vm550_vm11, %vm542_vm7 }
 0x13b   :  { %v742_v15 = vsel %vm678_vm12, %v2710_v60, 0  ;;  %vm539_vm15 = vmand %vm219_vm13, %vm411_vm8  ;;  %vm436_vm8 = vcmp.lt.s32.totalorder %v2829_v21, %v2743_v6  ;;  %vm244_vm12 = vcmp.ge.s32.totalorder %v2829_v21, %v2719_v63 }
 0x13c   :  { %1634 = vmatprep.mubr.bf16.mxu1 %v742_v15  ;;  %vm547_vm0 = vmand %vm227_vm10, %vm419_vm9  ;;  %vm236_vm9 = vcmp.ge.s32.totalorder %v2829_v21, %v2713_v62  ;;  %vm430_vm10 = vcmp.lt.s32.totalorder %v2841_v22, %v2735_v4 }
 0x13d   :  { %vm675_vm2 = vmpackc.low %vm547_vm0, %vm539_vm15 }
 0x13e   :  { %v739_v28 = vsel %vm675_vm2, %v2710_v60, 0  ;;  %vm541_vm5 = vmand %vm221_vm3, %vm413_vm14  ;;  %vm438_vm14 = vcmp.lt.s32.totalorder %v2841_v22, %v2743_v6  ;;  %vm246_vm2 = vcmp.ge.s32.totalorder %v2841_v22, %v2719_v63 }
 0x13f   :  { %1538 = vmatmul.mubr.bf16.gmra.mrb[52].mxu0 %v739_v28  ;;  %vm549_vm7 = vmand %vm229_vm4, %vm421_vm1  ;;  %vm238_vm1 = vcmp.ge.s32.totalorder %v2841_v22, %v2713_v62  ;;  %vm427_vm4 = vcmp.lt.s32.totalorder %v2853_v39, %v2735_v4 }
 0x140   :  { %vm677_vm11 = vmpackc.low %vm549_vm7, %vm541_vm5 }
 0x141   :  { %v741_v35 = vsel %vm677_vm11, %v2710_v60, 0  ;;  %vm556_vm13 = vmand %vm236_vm9, %vm428_vm6  ;;  %vm435_vm6 = vcmp.lt.s32.totalorder %v2853_v39, %v2743_v6  ;;  %vm243_vm11 = vcmp.ge.s32.totalorder %v2853_v39, %v2719_v63 }
 0x142   :  { %1635 = vmatmul.mubr.bf16.gmra.mrb[52].mxu1 %v741_v35  ;;  %vm564_vm15 = vmand %vm244_vm12, %vm436_vm8  ;;  %vm235_vm8 = vcmp.ge.s32.totalorder %v2853_v39, %v2713_v62  ;;  %vm429_vm12 = vcmp.lt.s32.totalorder %v2865_v24, %v2735_v4 }
 0x143   :  { %vm684_vm0 = vmpackc.low %vm564_vm15, %vm556_vm13 }
 0x144   :  { %v748_v38 = vsel %vm684_vm0, %v2759_v8, 0  ;;  %vm558_vm3 = vmand %vm238_vm1, %vm430_vm10  ;;  %vm437_vm10 = vcmp.lt.s32.totalorder %v2865_v24, %v2743_v6  ;;  %vm245_vm0 = vcmp.ge.s32.totalorder %v2865_v24, %v2719_v63 }
 0x145   :  { %1545 = vmatprep.mubr.bf16.mxu0 %v748_v38  ;;  %vm566_vm5 = vmand %vm246_vm2, %vm438_vm14  ;;  %vm237_vm14 = vcmp.ge.s32.totalorder %v2865_v24, %v2713_v62  ;;  %vm444_vm2 = vcmp.lt.s32.totalorder %v2829_v21, %v2784_v16 }
 0x146   :  { %vm686_vm7 = vmpackc.low %vm566_vm5, %vm558_vm3 }
 0x147   :  { %v750_v44 = vsel %vm686_vm7, %v2759_v8, 0  ;;  %vm555_vm9 = vmand %vm235_vm8, %vm427_vm4  ;;  %vm452_vm4 = vcmp.lt.s32.totalorder %v2829_v21, %v2792_v17  ;;  %vm260_vm7 = vcmp.ge.s32.totalorder %v2829_v21, %v2768_v11 }
 0x148   :  { %1642 = vmatprep.mubr.bf16.mxu1 %v750_v44  ;;  %vm563_vm13 = vmand %vm243_vm11, %vm435_vm6  ;;  %vm252_vm6 = vcmp.ge.s32.totalorder %v2829_v21, %v2762_v10  ;;  %vm446_vm11 = vcmp.lt.s32.totalorder %v2841_v22, %v2784_v16 }
 0x149   :  { %vm683_vm15 = vmpackc.low %vm563_vm13, %vm555_vm9 }
 0x14a   :  { %v747_v45 = vsel %vm683_vm15, %v2759_v8, 0  ;;  %vm557_vm1 = vmand %vm237_vm14, %vm429_vm12  ;;  %vm454_vm12 = vcmp.lt.s32.totalorder %v2841_v22, %v2792_v17  ;;  %vm262_vm15 = vcmp.ge.s32.totalorder %v2841_v22, %v2768_v11 }
 0x14b   :  { %1546 = vmatmul.mubr.bf16.gmra.mrb[56].mxu0 %v747_v45  ;;  %vm565_vm3 = vmand %vm245_vm0, %vm437_vm10  ;;  %vm254_vm10 = vcmp.ge.s32.totalorder %v2841_v22, %v2762_v10  ;;  %vm443_vm0 = vcmp.lt.s32.totalorder %v2853_v39, %v2784_v16 }
 0x14c   :  { %vm685_vm5 = vmpackc.low %vm565_vm3, %vm557_vm1 }
 0x14d   :  { %v749_v48 = vsel %vm685_vm5, %v2759_v8, 0  ;;  %vm572_vm8 = vmand %vm252_vm6, %vm444_vm2  ;;  %vm451_vm2 = vcmp.lt.s32.totalorder %v2853_v39, %v2792_v17  ;;  %vm259_vm5 = vcmp.ge.s32.totalorder %v2853_v39, %v2768_v11 }
 0x14e   :  { %1643 = vmatmul.mubr.bf16.gmra.mrb[56].mxu1 %v749_v48  ;;  %vm580_vm9 = vmand %vm260_vm7, %vm452_vm4  ;;  %vm251_vm4 = vcmp.ge.s32.totalorder %v2853_v39, %v2762_v10  ;;  %vm445_vm7 = vcmp.lt.s32.totalorder %v2865_v24, %v2784_v16 }
 0x14f   :  { %vm692_vm13 = vmpackc.low %vm580_vm9, %vm572_vm8 }
 0x150   :  { %v756_v50 = vsel %vm692_vm13, %v2808_v19, 0  ;;  %vm574_vm14 = vmand %vm254_vm10, %vm446_vm11  ;;  %vm453_vm11 = vcmp.lt.s32.totalorder %v2865_v24, %v2792_v17  ;;  %vm261_vm13 = vcmp.ge.s32.totalorder %v2865_v24, %v2768_v11 }
 0x151   :  { %1553 = vmatprep.mubr.bf16.mxu0 %v756_v50  ;;  %vm582_vm1 = vmand %vm262_vm15, %vm454_vm12  ;;  %vm253_vm12 = vcmp.ge.s32.totalorder %v2865_v24, %v2762_v10 }
 0x152   :  { %vm694_vm3 = vmpackc.low %vm582_vm1, %vm574_vm14 }
 0x153   :  { %v758_v51 = vsel %vm694_vm3, %v2808_v19, 0  ;;  %vm571_vm6 = vmand %vm251_vm4, %vm443_vm0 }
 0x154   :  { %1650 = vmatprep.mubr.bf16.mxu1 %v758_v51  ;;  %vm579_vm8 = vmand %vm259_vm5, %vm451_vm2 }
 0x155   :  { %vm691_vm9 = vmpackc.low %vm579_vm8, %vm571_vm6 }
 0x156   :  { %v755_v52 = vsel %vm691_vm9, %v2808_v19, 0  ;;  %vm573_vm10 = vmand %vm253_vm12, %vm445_vm7 }
 0x157   :  { %1554 = vmatmul.mubr.bf16.gmra.mrb[60].mxu0 %v755_v52  ;;  %vm581_vm15 = vmand %vm261_vm13, %vm453_vm11 }
 0x158   :  { %vm693_vm14 = vmpackc.low %vm581_vm15, %vm573_vm10 }
 0x159   :  { %v757_v53 = vsel %vm693_vm14, %v2808_v19, 0 }
 0x15a   :  { %1651 = vmatmul.mubr.bf16.gmra.mrb[60].mxu1 %v757_v53 }
 0x177   :  { %v1923_v54 = vpop.f32.mrb[0].mxu0 }
 0x178   :  { %v1924_v55 = vpop.f32.mrb[1].mxu0 }
 0x179   :  { %v1987_v57 = vpop.f32.mrb[0].mxu1  ;;  %v1925_v59 = vadd.f32 %v1924_v55, %v1923_v54  ;;  %v1926_v60 = vpop.f32.mrb[2].mxu0 }
 0x17a   :  { %v1988_v61 = vpop.f32.mrb[1].mxu1  ;;  %v1927_v62 = vpop.f32.mrb[3].mxu0 }
 0x17b   :  { %v1989_v63 = vadd.f32 %v1988_v61, %v1987_v57  ;;  %v1990_v1 = vpop.f32.mrb[2].mxu1  ;;  %v1928_v2 = vadd.f32 %v1927_v62, %v1926_v60 }
 0x17c   :  { %v1991_v4 = vpop.f32.mrb[3].mxu1 }
 0x17d   :  { %v3141_v6 = vadd.f32 %v1989_v63, %v1925_v59  ;;  %v1992_v7 = vadd.f32 %v1991_v4, %v1990_v1 }
 0x17f   :  { %v3143_v8 = vadd.f32 %v1992_v7, %v1928_v2 }
 0x182   :  { %v1929_v9 = vpop.f32.mrb[4].mxu0 }
 0x183   :  { %v1930_v10 = vpop.f32.mrb[5].mxu0 }
 0x184   :  { %v1931_v11 = vadd.f32 %v1930_v10, %v1929_v9  ;;  %v1932_v12 = vpop.f32.mrb[6].mxu0 }
 0x185   :  { %v1993_v14 = vpop.f32.mrb[4].mxu1  ;;  %v1933_v16 = vpop.f32.mrb[7].mxu0 }
 0x186   :  { %v1994_v17 = vpop.f32.mrb[5].mxu1  ;;  %v1934_v18 = vadd.f32 %v1933_v16, %v1932_v12 }
 0x187   :  { %v1995_v19 = vadd.f32 %v1994_v17, %v1993_v14  ;;  %v1996_v27 = vpop.f32.mrb[6].mxu1 }
 0x188   :  { %v1997_v31 = vpop.f32.mrb[7].mxu1 }
 0x189   :  { %v3145_v21 = vadd.f32 %v1995_v19, %v1931_v11  ;;  %v1998_v32 = vadd.f32 %v1997_v31, %v1996_v27 }
 0x18b   :  { %v3147_v22 = vadd.f32 %v1998_v32, %v1934_v18 }
 0x18e   :  { %v1935_v36 = vpop.f32.mrb[8].mxu0 }
 0x18f   :  { %v1936_v39 = vpop.f32.mrb[9].mxu0 }
 0x190   :  { %v1937_v40 = vadd.f32 %v1936_v39, %v1935_v36  ;;  %v1938_v24 = vpop.f32.mrb[10].mxu0 }
 0x191   :  { %v1999_v42 = vpop.f32.mrb[8].mxu1  ;;  %v1939_v20 = vpop.f32.mrb[11].mxu0 }
 0x192   :  { %v2000_v47 = vpop.f32.mrb[9].mxu1  ;;  %v1940_v23 = vadd.f32 %v1939_v20, %v1938_v24 }
 0x193   :  { %v2001_v25 = vadd.f32 %v2000_v47, %v1999_v42  ;;  %v2002_v26 = vpop.f32.mrb[10].mxu1 }
 0x194   :  { %v2003_v29 = vpop.f32.mrb[11].mxu1 }
 0x195   :  { %v3149_v30 = vadd.f32 %v2001_v25, %v1937_v40  ;;  %v2004_v33 = vadd.f32 %v2003_v29, %v2002_v26 }
 0x197   :  { %v3151_v34 = vadd.f32 %v2004_v33, %v1940_v23 }
 0x19a   :  { %v1941_v37 = vpop.f32.mrb[12].mxu0 }
 0x19b   :  { %v1942_v41 = vpop.f32.mrb[13].mxu0 }
 0x19c   :  { %v1943_v43 = vadd.f32 %v1942_v41, %v1941_v37  ;;  %v1944_v46 = vpop.f32.mrb[14].mxu0 }
 0x19d   :  { %v2005_v49 = vpop.f32.mrb[12].mxu1  ;;  %v1945_v56 = vpop.f32.mrb[15].mxu0 }
 0x19e   :  { %v2006_v58 = vpop.f32.mrb[13].mxu1  ;;  %v1946_v0 = vadd.f32 %v1945_v56, %v1944_v46 }
 0x19f   :  { %v2007_v3 = vadd.f32 %v2006_v58, %v2005_v49  ;;  %v2008_v5 = vpop.f32.mrb[14].mxu1 }
 0x1a0   :  { %v2009_v13 = vpop.f32.mrb[15].mxu1 }
 0x1a1   :  { %v3153_v15 = vadd.f32 %v2007_v3, %v1943_v43  ;;  %v2010_v28 = vadd.f32 %v2009_v13, %v2008_v5 }
 0x1a3   :  { %v3155_v35 = vadd.f32 %v2010_v28, %v1946_v0 }
 0x1a6   :  { %v1947_v38 = vpop.f32.mrb[16].mxu0 }
 0x1a7   :  { %v1948_v44 = vpop.f32.mrb[17].mxu0 }
 0x1a8   :  { %v1949_v45 = vadd.f32 %v1948_v44, %v1947_v38  ;;  %v1950_v48 = vpop.f32.mrb[18].mxu0 }
 0x1a9   :  { %v2011_v50 = vpop.f32.mrb[16].mxu1  ;;  %v1951_v51 = vpop.f32.mrb[19].mxu0 }
 0x1aa   :  { %v2012_v52 = vpop.f32.mrb[17].mxu1  ;;  %v1952_v53 = vadd.f32 %v1951_v51, %v1950_v48 }
 0x1ab   :  { %v2013_v54 = vadd.f32 %v2012_v52, %v2011_v50  ;;  %v2014_v55 = vpop.f32.mrb[18].mxu1 }
 0x1ac   :  { %v2015_v57 = vpop.f32.mrb[19].mxu1 }
 0x1ad   :  { %v3157_v59 = vadd.f32 %v2013_v54, %v1949_v45  ;;  %v2016_v60 = vadd.f32 %v2015_v57, %v2014_v55 }
 0x1af   :  { %v3159_v61 = vadd.f32 %v2016_v60, %v1952_v53 }
 0x1b2   :  { %v1953_v62 = vpop.f32.mrb[20].mxu0 }
 0x1b3   :  { %v1954_v63 = vpop.f32.mrb[21].mxu0 }
 0x1b4   :  { %v1955_v1 = vadd.f32 %v1954_v63, %v1953_v62  ;;  %v1956_v2 = vpop.f32.mrb[22].mxu0 }
 0x1b5   :  { %v2017_v4 = vpop.f32.mrb[20].mxu1  ;;  %v1957_v7 = vpop.f32.mrb[23].mxu0 }
 0x1b6   :  { %v2018_v9 = vpop.f32.mrb[21].mxu1  ;;  %v1958_v10 = vadd.f32 %v1957_v7, %v1956_v2 }
 0x1b7   :  { %v2019_v11 = vadd.f32 %v2018_v9, %v2017_v4  ;;  %v2020_v12 = vpop.f32.mrb[22].mxu1 }
 0x1b8   :  { %v2021_v14 = vpop.f32.mrb[23].mxu1 }
 0x1b9   :  { %v3161_v16 = vadd.f32 %v2019_v11, %v1955_v1  ;;  %v2022_v17 = vadd.f32 %v2021_v14, %v2020_v12 }
 0x1bb   :  { %v3163_v18 = vadd.f32 %v2022_v17, %v1958_v10 }
 0x1be   :  { %v1959_v19 = vpop.f32.mrb[24].mxu0 }
 0x1bf   :  { %v1960_v27 = vpop.f32.mrb[25].mxu0 }
 0x1c0   :  { %v1961_v31 = vadd.f32 %v1960_v27, %v1959_v19  ;;  %v1962_v32 = vpop.f32.mrb[26].mxu0 }
 0x1c1   :  { %v2023_v36 = vpop.f32.mrb[24].mxu1  ;;  %v1963_v39 = vpop.f32.mrb[27].mxu0 }
 0x1c2   :  { %v2024_v40 = vpop.f32.mrb[25].mxu1  ;;  %v1964_v24 = vadd.f32 %v1963_v39, %v1962_v32 }
 0x1c3   :  { %v2025_v42 = vadd.f32 %v2024_v40, %v2023_v36  ;;  %v2026_v20 = vpop.f32.mrb[26].mxu1 }
 0x1c4   :  { %v2027_v47 = vpop.f32.mrb[27].mxu1 }
 0x1c5   :  { %v3165_v23 = vadd.f32 %v2025_v42, %v1961_v31  ;;  %v2028_v25 = vadd.f32 %v2027_v47, %v2026_v20 }
 0x1c7   :  { %v3167_v26 = vadd.f32 %v2028_v25, %v1964_v24 }
 0x1ca   :  { %v1965_v29 = vpop.f32.mrb[28].mxu0 }
 0x1cb   :  { %v1966_v33 = vpop.f32.mrb[29].mxu0 }
 0x1cc   :  { %v1967_v37 = vadd.f32 %v1966_v33, %v1965_v29  ;;  %v1968_v41 = vpop.f32.mrb[30].mxu0 }
 0x1cd   :  { %v2029_v43 = vpop.f32.mrb[28].mxu1  ;;  %v1969_v46 = vpop.f32.mrb[31].mxu0 }
 0x1ce   :  { %v2030_v49 = vpop.f32.mrb[29].mxu1  ;;  %v1970_v56 = vadd.f32 %v1969_v46, %v1968_v41 }
 0x1cf   :  { %v2031_v58 = vadd.f32 %v2030_v49, %v2029_v43  ;;  %v2032_v0 = vpop.f32.mrb[30].mxu1 }
 0x1d0   :  { %v2033_v3 = vpop.f32.mrb[31].mxu1 }
 0x1d1   :  { %v3169_v5 = vadd.f32 %v2031_v58, %v1967_v37  ;;  %v2034_v13 = vadd.f32 %v2033_v3, %v2032_v0 }
 0x1d3   :  { %v3171_v28 = vadd.f32 %v2034_v13, %v1970_v56 }
 0x1d6   :  { %v2051_v38 = vpop.f32.mrb[32].mxu0 }
 0x1d7   :  { %v2052_v44 = vpop.f32.mrb[33].mxu0 }
 0x1d8   :  { %v2053_v45 = vadd.f32 %v2052_v44, %v2051_v38  ;;  %v2054_v48 = vpop.f32.mrb[34].mxu0 }
 0x1d9   :  { %v2115_v50 = vpop.f32.mrb[32].mxu1  ;;  %v2055_v51 = vpop.f32.mrb[35].mxu0 }
 0x1da   :  { %v1500_v52 = vadd.f32 %v2053_v45, %v3141_v6  ;;  %v2116_v53 = vpop.f32.mrb[33].mxu1  ;;  %v2056_v54 = vadd.f32 %v2055_v51, %v2054_v48 }
 0x1db   :  { %v2117_v55 = vadd.f32 %v2116_v53, %v2115_v50  ;;  %v2118_v57 = vpop.f32.mrb[34].mxu1 }
 0x1dc   :  { %v1503_v60 = vadd.f32 %v2056_v54, %v3143_v8  ;;  %v2119_v62 = vpop.f32.mrb[35].mxu1 }
 0x1dd   :  { %v1597_v63 = vadd.f32 %v2117_v55, %v1500_v52  ;;  %v2120_v1 = vadd.f32 %v2119_v62, %v2118_v57 }
 0x1df   :  { %v1600_v2 = vadd.f32 %v2120_v1, %v1503_v60 }
 0x1e1   :  { %v1863_v4 = vpack.c.bf16 %v1600_v2, %v1597_v63 }
 0x1e2   :  { %v2057_v7 = vpop.f32.mrb[36].mxu0 }
 0x1e3   :  { %1864 = vst [vmem:[#allocation5] sm:$0xff] %v1863_v4   ;;  %v2058_v9 = vpop.f32.mrb[37].mxu0 }
 0x1e4   :  { %v2059_v10 = vadd.f32 %v2058_v9, %v2057_v7  ;;  %v2060_v11 = vpop.f32.mrb[38].mxu0 }
 0x1e5   :  { %v2121_v12 = vpop.f32.mrb[36].mxu1  ;;  %v2061_v14 = vpop.f32.mrb[39].mxu0 }
 0x1e6   :  { %v1508_v6 = vadd.f32 %v2059_v10, %v3145_v21  ;;  %v2122_v17 = vpop.f32.mrb[37].mxu1  ;;  %v2062_v19 = vadd.f32 %v2061_v14, %v2060_v11 }
 0x1e7   :  { %v2123_v27 = vadd.f32 %v2122_v17, %v2121_v12  ;;  %v2124_v31 = vpop.f32.mrb[38].mxu1 }
 0x1e8   :  { %v1511_v8 = vadd.f32 %v2062_v19, %v3147_v22  ;;  %v2125_v32 = vpop.f32.mrb[39].mxu1 }
 0x1e9   :  { %v1605_v36 = vadd.f32 %v2123_v27, %v1508_v6  ;;  %v2126_v39 = vadd.f32 %v2125_v32, %v2124_v31 }
 0x1eb   :  { %v1608_v40 = vadd.f32 %v2126_v39, %v1511_v8 }
 0x1ed   :  { %v1868_v24 = vpack.c.bf16 %v1608_v40, %v1605_v36 }
 0x1ee   :  { %v2063_v42 = vpop.f32.mrb[40].mxu0 }
 0x1ef   :  { %1900 = vst [vmem:[#allocation5 + $0x8] sm:$0xff] %v1868_v24   ;;  %v2064_v20 = vpop.f32.mrb[41].mxu0 }
 0x1f0   :  { %v2065_v47 = vadd.f32 %v2064_v20, %v2063_v42  ;;  %v2066_v25 = vpop.f32.mrb[42].mxu0 }
 0x1f1   :  { %v2127_v29 = vpop.f32.mrb[40].mxu1  ;;  %v2067_v33 = vpop.f32.mrb[43].mxu0 }
 0x1f2   :  { %v1516_v21 = vadd.f32 %v2065_v47, %v3149_v30  ;;  %v2128_v37 = vpop.f32.mrb[41].mxu1  ;;  %v2068_v41 = vadd.f32 %v2067_v33, %v2066_v25 }
 0x1f3   :  { %v2129_v43 = vadd.f32 %v2128_v37, %v2127_v29  ;;  %v2130_v46 = vpop.f32.mrb[42].mxu1 }
 0x1f4   :  { %v1519_v22 = vadd.f32 %v2068_v41, %v3151_v34  ;;  %v2131_v49 = vpop.f32.mrb[43].mxu1 }
 0x1f5   :  { %v1613_v56 = vadd.f32 %v2129_v43, %v1516_v21  ;;  %v2132_v58 = vadd.f32 %v2131_v49, %v2130_v46 }
 0x1f7   :  { %v1616_v0 = vadd.f32 %v2132_v58, %v1519_v22 }
 0x1f9   :  { %v1873_v3 = vpack.c.bf16 %v1616_v0, %v1613_v56 }
 0x1fa   :  { %v2069_v13 = vpop.f32.mrb[44].mxu0 }
 0x1fb   :  { %1901 = vst [vmem:[#allocation5 + $0x10] sm:$0xff] %v1873_v3   ;;  %v2070_v38 = vpop.f32.mrb[45].mxu0 }
 0x1fc   :  { %v2071_v44 = vadd.f32 %v2070_v38, %v2069_v13  ;;  %v2072_v45 = vpop.f32.mrb[46].mxu0 }
 0x1fd   :  { %v2133_v48 = vpop.f32.mrb[44].mxu1  ;;  %v2073_v50 = vpop.f32.mrb[47].mxu0 }
 0x1fe   :  { %v1524_v30 = vadd.f32 %v2071_v44, %v3153_v15  ;;  %v2134_v51 = vpop.f32.mrb[45].mxu1  ;;  %v2074_v52 = vadd.f32 %v2073_v50, %v2072_v45 }
 0x1ff   :  { %v2135_v53 = vadd.f32 %v2134_v51, %v2133_v48  ;;  %v2136_v54 = vpop.f32.mrb[46].mxu1 }
 0x200   :  { %v1527_v34 = vadd.f32 %v2074_v52, %v3155_v35  ;;  %v2137_v55 = vpop.f32.mrb[47].mxu1 }
 0x201   :  { %v1621_v57 = vadd.f32 %v2135_v53, %v1524_v30  ;;  %v2138_v60 = vadd.f32 %v2137_v55, %v2136_v54 }
 0x203   :  { %v1624_v62 = vadd.f32 %v2138_v60, %v1527_v34 }
 0x205   :  { %v1878_v63 = vpack.c.bf16 %v1624_v62, %v1621_v57 }
 0x206   :  { %v2075_v1 = vpop.f32.mrb[48].mxu0 }
 0x207   :  { %1902 = vst [vmem:[#allocation5 + $0x18] sm:$0xff] %v1878_v63   ;;  %v2076_v2 = vpop.f32.mrb[49].mxu0 }
 0x208   :  { %v2077_v4 = vadd.f32 %v2076_v2, %v2075_v1  ;;  %v2078_v7 = vpop.f32.mrb[50].mxu0 }
 0x209   :  { %v2139_v9 = vpop.f32.mrb[48].mxu1  ;;  %v2079_v10 = vpop.f32.mrb[51].mxu0 }
 0x20a   :  { %v1532_v15 = vadd.f32 %v2077_v4, %v3157_v59  ;;  %v2140_v11 = vpop.f32.mrb[49].mxu1  ;;  %v2080_v12 = vadd.f32 %v2079_v10, %v2078_v7 }
 0x20b   :  { %v2141_v14 = vadd.f32 %v2140_v11, %v2139_v9  ;;  %v2142_v6 = vpop.f32.mrb[50].mxu1 }
 0x20c   :  { %v1535_v35 = vadd.f32 %v2080_v12, %v3159_v61  ;;  %v2143_v17 = vpop.f32.mrb[51].mxu1 }
 0x20d   :  { %v1629_v19 = vadd.f32 %v2141_v14, %v1532_v15  ;;  %v2144_v27 = vadd.f32 %v2143_v17, %v2142_v6 }
 0x20f   :  { %v1632_v31 = vadd.f32 %v2144_v27, %v1535_v35 }
 0x211   :  { %v1883_v8 = vpack.c.bf16 %v1632_v31, %v1629_v19 }
 0x212   :  { %v2081_v32 = vpop.f32.mrb[52].mxu0 }
 0x213   :  { %1903 = vst [vmem:[#allocation5 + $0x20] sm:$0xff] %v1883_v8   ;;  %v2082_v36 = vpop.f32.mrb[53].mxu0 }
 0x214   :  { %v2083_v39 = vadd.f32 %v2082_v36, %v2081_v32  ;;  %v2084_v40 = vpop.f32.mrb[54].mxu0 }
 0x215   :  { %v2145_v24 = vpop.f32.mrb[52].mxu1  ;;  %v2085_v42 = vpop.f32.mrb[55].mxu0 }
 0x216   :  { %v1540_v59 = vadd.f32 %v2083_v39, %v3161_v16  ;;  %v2146_v20 = vpop.f32.mrb[53].mxu1  ;;  %v2086_v47 = vadd.f32 %v2085_v42, %v2084_v40 }
 0x217   :  { %v2147_v25 = vadd.f32 %v2146_v20, %v2145_v24  ;;  %v2148_v29 = vpop.f32.mrb[54].mxu1 }
 0x218   :  { %v1543_v61 = vadd.f32 %v2086_v47, %v3163_v18  ;;  %v2149_v33 = vpop.f32.mrb[55].mxu1 }
 0x219   :  { %v1637_v21 = vadd.f32 %v2147_v25, %v1540_v59  ;;  %v2150_v37 = vadd.f32 %v2149_v33, %v2148_v29 }
 0x21b   :  { %v1640_v41 = vadd.f32 %v2150_v37, %v1543_v61 }
 0x21d   :  { %v1888_v43 = vpack.c.bf16 %v1640_v41, %v1637_v21 }
 0x21e   :  { %v2087_v46 = vpop.f32.mrb[56].mxu0 }
 0x21f   :  { %1904 = vst [vmem:[#allocation5 + $0x28] sm:$0xff] %v1888_v43   ;;  %v2088_v22 = vpop.f32.mrb[57].mxu0 }
 0x220   :  { %v2089_v49 = vadd.f32 %v2088_v22, %v2087_v46  ;;  %v2090_v56 = vpop.f32.mrb[58].mxu0 }
 0x221   :  { %v2151_v58 = vpop.f32.mrb[56].mxu1  ;;  %v2091_v0 = vpop.f32.mrb[59].mxu0 }
 0x222   :  { %v1548_v16 = vadd.f32 %v2089_v49, %v3165_v23  ;;  %v2152_v3 = vpop.f32.mrb[57].mxu1  ;;  %v2092_v13 = vadd.f32 %v2091_v0, %v2090_v56 }
 0x223   :  { %v2153_v38 = vadd.f32 %v2152_v3, %v2151_v58  ;;  %v2154_v44 = vpop.f32.mrb[58].mxu1 }
 0x224   :  { %v1551_v18 = vadd.f32 %v2092_v13, %v3167_v26  ;;  %v2155_v45 = vpop.f32.mrb[59].mxu1 }
 0x225   :  { %v1645_v48 = vadd.f32 %v2153_v38, %v1548_v16  ;;  %v2156_v50 = vadd.f32 %v2155_v45, %v2154_v44 }
 0x227   :  { %v1648_v30 = vadd.f32 %v2156_v50, %v1551_v18 }
 0x229   :  { %v1893_v51 = vpack.c.bf16 %v1648_v30, %v1645_v48 }
 0x22a   :  { %v2093_v52 = vpop.f32.mrb[60].mxu0 }
 0x22b   :  { %1905 = vst [vmem:[#allocation5 + $0x30] sm:$0xff] %v1893_v51   ;;  %v2094_v53 = vpop.f32.mrb[61].mxu0 }
 0x22c   :  { %v2095_v54 = vadd.f32 %v2094_v53, %v2093_v52  ;;  %v2096_v34 = vpop.f32.mrb[62].mxu0 }
 0x22d   :  { %v2157_v55 = vpop.f32.mrb[60].mxu1  ;;  %v2097_v57 = vpop.f32.mrb[63].mxu0 }
 0x22e   :  { %v1556_v23 = vadd.f32 %v2095_v54, %v3169_v5  ;;  %v2158_v60 = vpop.f32.mrb[61].mxu1  ;;  %v2098_v62 = vadd.f32 %v2097_v57, %v2096_v34 }
 0x22f   :  { %v2159_v63 = vadd.f32 %v2158_v60, %v2157_v55  ;;  %v2160_v1 = vpop.f32.mrb[62].mxu1 }
 0x230   :  { %v1559_v26 = vadd.f32 %v2098_v62, %v3171_v28  ;;  %v2161_v2 = vpop.f32.mrb[63].mxu1 }
 0x231   :  { %v1653_v4 = vadd.f32 %v2159_v63, %v1556_v23  ;;  %v2162_v7 = vadd.f32 %v2161_v2, %v2160_v1 }
 0x233   :  { %v1656_v9 = vadd.f32 %v2162_v7, %v1559_v26 }
 0x235   :  { %v1898_v10 = vpack.c.bf16 %v1656_v9, %v1653_v4 }
 0x237   :  { %1906 = vst [vmem:[#allocation5 + $0x38] sm:$0xff] %v1898_v10  }
 0x238   :  { %2275 = shalt.err (!%p2272_p12)
}
 0x239   :  { %s2276_s25 = scalar_lea.hbm %s3207_s3, 1024 }
 0x23a   :  { %p2277_p13 = scmp.ne.s32.totalorder %s3207_s3, %s2276_s25  ;;  %p2280_p0 = scmp.lt.u32.totalorder %s2276_s25, %s3207_s3 }
 0x23c   :  { %p2282_p1 = pnand %p2280_p0, %p2277_p13 }
 0x23e   :  { %2285 = shalt.err (!%p2282_p1)
}
 0x23f   :  { %1750 = dma.vmem_to_hbm [thread:$0]  %s1745_s19, 1024, %s3207_s3, [#allocation4], %s2291_s22, %s2291_s22, %s2292_s23  }
 0x240   :  { %2288 = dma.done.wait [#allocation4], 1024  }
 0x241   :  { %2289 = vsyncadd [#allocation4], 4294966272 }
 0x242   :  { %1754 = vsyncpa [#allocation3], 1 }
 0x243   :  { %1755 = vsyncpa [#allocation4], 1 }

</bundles_post_ra>
